<compile_context>
chip_gen: v7x
topology: tpu7x:2x2x1
jax: 0.10.0
libtpu: 0.0.40
codegen_flags: <defaults>
</compile_context>

<pallas_src>
import functools
import math

import jax
import jax.numpy as jnp
from jax.experimental import pallas as pl
from jax.experimental.pallas import tpu as pltpu

KH = KW = 3          # fixed 3x3 kernel, padding=1
N_LAYERS = 4         # four identical conv layers (shared weights)


def _num_tensorcores() -> int:
    """Best-effort TensorCore count per chip (v7x has 2, v5e/v6e have 1)."""
    try:
        kind = jax.devices()[0].device_kind.lower()
    except Exception:
        return 1
    return 2 if ("v7" in kind or "7x" in kind) else 1


def _fused_conv4_kernel(wmat_ref, b_ref, mask_ref, x_ref, o_ref, *, C, H, W, L):
    # wmat_ref : VMEM (C, 9*C)    weights, column order t*C + ci, t = kh*3 + kw
    # b_ref    : VMEM (C, 1)      bias
    # mask_ref : VMEM (9*C, L)    per-tap border masks (tap row repeated per channel,
    #                             tiled once per image along lanes)
    # x_ref    : VMEM (1, C, L)   flattened activations, images folded into lanes
    # o_ref    : VMEM (1, C, L)
    wmat = wmat_ref[...]                                    # (C, 9C)  loaded once
    bias = jnp.broadcast_to(b_ref[...], (C, L))             # hoisted broadcast
    bigmask = mask_ref[...]                                  # (9C, L)  loaded once

    act = x_ref[0]                                           # (C, L) float32

    for _ in range(N_LAYERS):
        # Build the (9C, L) im2col patch in registers: for tap t = (dh, dw),
        # pltpu.roll shifts the flat activation by dh*W + dw; the border mask
        # zeros every position whose tap falls outside its own image (this is
        # both the conv zero padding and the anti-leak guard between images
        # folded into the same lane row).
        rows = []
        for t in range(KH * KW):
            dh = t // KW - 1
            dw = t % KW - 1
            s = dh * W + dw
            if s == 0:
                rows.append(act)                             # center tap: no shift
            else:
                rows.append(pltpu.roll(act, shift=(-s) % L, axis=1))
        patch = jnp.concatenate(rows, axis=0) * bigmask      # (9C, L)

        # One MXU matmul per layer: (C, 9C) @ (9C, L) -> (C, L), plus bias.
        act = jnp.dot(wmat, patch,
                      preferred_element_type=jnp.float32,
                      precision=jax.lax.Precision.HIGHEST) + bias

    o_ref[0] = act.astype(o_ref.dtype)


def vanilla_model_pallas(x, w, b):
    """x: (N, C, H, W) f32; w: (C, C, 3, 3) f32; b: (C,) f32 -> (N, C, H, W)."""
    N, Cin, H, W = x.shape
    Cout = w.shape[0]
    assert Cin == Cout, "fused layer chaining requires Cin == Cout"
    HW = H * W

    # Grid steps: 1 on single-TC chips (v5e/v6e), 2 on v7x (both TensorCores),
    # constrained to divide the batch evenly.
    G = math.gcd(N, _num_tensorcores())
    imgs = N // G                        # images folded into lanes per grid step
    L = imgs * HW

    # (N, C, H, W) -> (G, C, imgs*HW): consecutive images concatenated along lanes.
    x_fold = (x.reshape(G, imgs, Cin, HW)
                .transpose(0, 2, 1, 3)
                .reshape(G, Cin, L)
                .astype(jnp.float32))

    # Weight matrix: column order t*Cin + ci (t = kh*3 + kw) matches patch rows.
    wmat = jnp.transpose(w, (0, 2, 3, 1)).reshape(
        Cout, KH * KW * Cin).astype(jnp.float32)
    b_col = b.reshape(Cout, 1).astype(jnp.float32)

    # Border masks: row t*Cin + ci = 1.0 where (h+dh, w+dw) stays inside its image.
    hh = jnp.arange(H)[:, None]
    ww = jnp.arange(W)[None, :]
    mask_rows = []
    for t in range(KH * KW):
        dh, dw = t // KW - 1, t % KW - 1
        m = ((hh + dh >= 0) & (hh + dh < H) &
             (ww + dw >= 0) & (ww + dw < W))
        mask_rows.append(m.reshape(HW))
    mask9 = jnp.stack(mask_rows, axis=0).astype(jnp.float32)     # (9, HW)
    bigmask = jnp.repeat(mask9, Cin, axis=0)                     # (9*Cin, HW)
    bigmask = jnp.tile(bigmask, (1, imgs))                       # (9*Cin, L)

    kernel = functools.partial(_fused_conv4_kernel, C=Cin, H=H, W=W, L=L)

    out_fold = pl.pallas_call(
        kernel,
        out_shape=jax.ShapeDtypeStruct((G, Cout, L), jnp.float32),
        grid=(G,),
        in_specs=[
            pl.BlockSpec((Cout, KH * KW * Cin), lambda g: (0, 0)),   # weights
            pl.BlockSpec((Cout, 1), lambda g: (0, 0)),               # bias
            pl.BlockSpec((KH * KW * Cin, L), lambda g: (0, 0)),      # masks
            pl.BlockSpec((1, Cin, L), lambda g: (g, 0, 0)),          # input
        ],
        out_specs=pl.BlockSpec((1, Cout, L), lambda g: (g, 0, 0)),
        compiler_params=pltpu.CompilerParams(
            dimension_semantics=("parallel",)),
    )(wmat, b_col, bigmask, x_fold)

    # Unfold lanes back to (N, C, H, W).
    out = (out_fold.reshape(G, Cout, imgs, HW)
                   .transpose(0, 2, 1, 3)
                   .reshape(N, Cout, H, W))
    return out


def _ref_conv(x, w, b):
    # pure-JAX reference (lax conv) for correctness checking
    out = jax.lax.conv_general_dilated(
        x, w, window_strides=(1, 1), padding="SAME",
        dimension_numbers=("NCHW", "OIHW", "NCHW"),
        precision=jax.lax.Precision.HIGHEST)
    return out + b[None, :, None, None]


if __name__ == "__main__":
    key = jax.random.PRNGKey(0)
    kx, kw_, kb = jax.random.split(key, 3)

    N, C, H, W = 2, 3, 16, 16
    x = jax.random.normal(kx, (N, C, H, W), dtype=jnp.float32)

    # Deterministic init mimicking nn.Conv2d default (uniform +-1/sqrt(fan_in)).
    # TODO(synk): bit-exact torch.manual_seed(42) Kaiming values are not
    # reproduced; only shapes/distribution are.
    fan_in = C * KH * KW
    bound = float(1.0 / (fan_in ** 0.5))
    w = jax.random.uniform(kw_, (C, C, KH, KW), jnp.float32, -bound, bound)
    b = jax.random.uniform(kb, (C,), jnp.float32, -bound, bound)

    fn = jax.jit(vanilla_model_pallas)
    out = jax.block_until_ready(fn(x, w, b))

    # Sanity check against pure-JAX reference (4 identical conv layers).
    ref = x
    for _ in range(N_LAYERS):
        ref = _ref_conv(ref, w, b)
    assert out.shape == (N, C, H, W)
    assert jnp.allclose(out, ref, atol=1e-3, rtol=1e-3), "mismatch vs reference"

    print("KERNEL_OK")
</pallas_src>

<mosaic_0001>
module attributes {stable_mosaic.version = 11 : i64} {
  func.func @_fused_conv4_kernel(%arg0: i32, %arg1: memref<3x27xf32, #tpu.memory_space<vmem>>, %arg2: memref<3x1xf32, #tpu.memory_space<vmem>>, %arg3: memref<27x512xf32, #tpu.memory_space<vmem>>, %arg4: memref<1x3x512xf32, #tpu.memory_space<vmem>>, %arg5: memref<1x3x512xf32, #tpu.memory_space<vmem>>) attributes {dimension_semantics = [#tpu.dimension_semantics<parallel>], iteration_bounds = array<i64: 1>, scalar_prefetch = 0 : i64, scratch_operands = 0 : i64, tpu.core_type = #tpu.core_type<tc>, window_params = [{pipeline_mode = #tpu.pipeline_mode<synchronous>, transform_indices = @transform_0, window_bounds = array<i64: 3, 27>}, {pipeline_mode = #tpu.pipeline_mode<synchronous>, transform_indices = @transform_1, window_bounds = array<i64: 3, 1>}, {pipeline_mode = #tpu.pipeline_mode<synchronous>, transform_indices = @transform_2, window_bounds = array<i64: 27, 512>}, {transform_indices = @transform_3, window_bounds = array<i64: 1, 3, 512>}, {transform_indices = @transform_4, window_bounds = array<i64: 1, 3, 512>}]} {
    %c0 = arith.constant 0 : index
    %c0_0 = arith.constant 0 : index
    %0 = vector.load %arg1[%c0, %c0_0] : memref<3x27xf32, #tpu.memory_space<vmem>>, vector<3x27xf32>
    %c0_1 = arith.constant 0 : index
    %c0_2 = arith.constant 0 : index
    %1 = vector.load %arg2[%c0_1, %c0_2] : memref<3x1xf32, #tpu.memory_space<vmem>>, vector<3x1xf32>
    %2 = vector.shape_cast %1 : vector<3x1xf32> to vector<3x1xf32>
    %3 = vector.broadcast %2 : vector<3x1xf32> to vector<3x512xf32>
    %c0_3 = arith.constant 0 : index
    %c0_4 = arith.constant 0 : index
    %4 = vector.load %arg3[%c0_3, %c0_4] : memref<27x512xf32, #tpu.memory_space<vmem>>, vector<27x512xf32>
    %c0_5 = arith.constant 0 : index
    %c0_6 = arith.constant 0 : index
    %c0_7 = arith.constant 0 : index
    %5 = vector.load %arg4[%c0_5, %c0_6, %c0_7] : memref<1x3x512xf32, #tpu.memory_space<vmem>>, vector<1x3x512xf32>
    %6 = vector.shape_cast %5 : vector<1x3x512xf32> to vector<3x512xf32>
    %c17_i32 = arith.constant 17 : i32
    %7 = tpu.dynamic_rotate %6 by %c17_i32 dim 1 : vector<3x512xf32>, i32 -> vector<3x512xf32>
    %c16_i32 = arith.constant 16 : i32
    %8 = tpu.dynamic_rotate %6 by %c16_i32 dim 1 : vector<3x512xf32>, i32 -> vector<3x512xf32>
    %c15_i32 = arith.constant 15 : i32
    %9 = tpu.dynamic_rotate %6 by %c15_i32 dim 1 : vector<3x512xf32>, i32 -> vector<3x512xf32>
    %c1_i32 = arith.constant 1 : i32
    %10 = tpu.dynamic_rotate %6 by %c1_i32 dim 1 : vector<3x512xf32>, i32 -> vector<3x512xf32>
    %c511_i32 = arith.constant 511 : i32
    %11 = tpu.dynamic_rotate %6 by %c511_i32 dim 1 : vector<3x512xf32>, i32 -> vector<3x512xf32>
    %c497_i32 = arith.constant 497 : i32
    %12 = tpu.dynamic_rotate %6 by %c497_i32 dim 1 : vector<3x512xf32>, i32 -> vector<3x512xf32>
    %c496_i32 = arith.constant 496 : i32
    %13 = tpu.dynamic_rotate %6 by %c496_i32 dim 1 : vector<3x512xf32>, i32 -> vector<3x512xf32>
    %c495_i32 = arith.constant 495 : i32
    %14 = tpu.dynamic_rotate %6 by %c495_i32 dim 1 : vector<3x512xf32>, i32 -> vector<3x512xf32>
    %15 = tpu.concatenate %7, %8, %9, %10, %6, %11, %12, %13, %14 in 0 : vector<3x512xf32>, vector<3x512xf32>, vector<3x512xf32>, vector<3x512xf32>, vector<3x512xf32>, vector<3x512xf32>, vector<3x512xf32>, vector<3x512xf32>, vector<3x512xf32> -> vector<27x512xf32>
    %16 = arith.mulf %15, %4 : vector<27x512xf32>
    %cst = arith.constant dense<0.000000e+00> : vector<3x512xf32>
    %17 = tpu.matmul %0, %16, %cst {dimension_numbers = #tpu.dot_dimension_numbers<[1], [0], [0], [1], [0, 0, 1, 1], [], []>, precision = #tpu.contract_precision<fp32>} : vector<3x27xf32>, vector<27x512xf32>, vector<3x512xf32> -> vector<3x512xf32>
    %18 = arith.addf %17, %3 : vector<3x512xf32>
    %c17_i32_8 = arith.constant 17 : i32
    %19 = tpu.dynamic_rotate %18 by %c17_i32_8 dim 1 : vector<3x512xf32>, i32 -> vector<3x512xf32>
    %c16_i32_9 = arith.constant 16 : i32
    %20 = tpu.dynamic_rotate %18 by %c16_i32_9 dim 1 : vector<3x512xf32>, i32 -> vector<3x512xf32>
    %c15_i32_10 = arith.constant 15 : i32
    %21 = tpu.dynamic_rotate %18 by %c15_i32_10 dim 1 : vector<3x512xf32>, i32 -> vector<3x512xf32>
    %c1_i32_11 = arith.constant 1 : i32
    %22 = tpu.dynamic_rotate %18 by %c1_i32_11 dim 1 : vector<3x512xf32>, i32 -> vector<3x512xf32>
    %c511_i32_12 = arith.constant 511 : i32
    %23 = tpu.dynamic_rotate %18 by %c511_i32_12 dim 1 : vector<3x512xf32>, i32 -> vector<3x512xf32>
    %c497_i32_13 = arith.constant 497 : i32
    %24 = tpu.dynamic_rotate %18 by %c497_i32_13 dim 1 : vector<3x512xf32>, i32 -> vector<3x512xf32>
    %c496_i32_14 = arith.constant 496 : i32
    %25 = tpu.dynamic_rotate %18 by %c496_i32_14 dim 1 : vector<3x512xf32>, i32 -> vector<3x512xf32>
    %c495_i32_15 = arith.constant 495 : i32
    %26 = tpu.dynamic_rotate %18 by %c495_i32_15 dim 1 : vector<3x512xf32>, i32 -> vector<3x512xf32>
    %27 = tpu.concatenate %19, %20, %21, %22, %18, %23, %24, %25, %26 in 0 : vector<3x512xf32>, vector<3x512xf32>, vector<3x512xf32>, vector<3x512xf32>, vector<3x512xf32>, vector<3x512xf32>, vector<3x512xf32>, vector<3x512xf32>, vector<3x512xf32> -> vector<27x512xf32>
    %28 = arith.mulf %27, %4 : vector<27x512xf32>
    %cst_16 = arith.constant dense<0.000000e+00> : vector<3x512xf32>
    %29 = tpu.matmul %0, %28, %cst_16 {dimension_numbers = #tpu.dot_dimension_numbers<[1], [0], [0], [1], [0, 0, 1, 1], [], []>, precision = #tpu.contract_precision<fp32>} : vector<3x27xf32>, vector<27x512xf32>, vector<3x512xf32> -> vector<3x512xf32>
    %30 = arith.addf %29, %3 : vector<3x512xf32>
    %c17_i32_17 = arith.constant 17 : i32
    %31 = tpu.dynamic_rotate %30 by %c17_i32_17 dim 1 : vector<3x512xf32>, i32 -> vector<3x512xf32>
    %c16_i32_18 = arith.constant 16 : i32
    %32 = tpu.dynamic_rotate %30 by %c16_i32_18 dim 1 : vector<3x512xf32>, i32 -> vector<3x512xf32>
    %c15_i32_19 = arith.constant 15 : i32
    %33 = tpu.dynamic_rotate %30 by %c15_i32_19 dim 1 : vector<3x512xf32>, i32 -> vector<3x512xf32>
    %c1_i32_20 = arith.constant 1 : i32
    %34 = tpu.dynamic_rotate %30 by %c1_i32_20 dim 1 : vector<3x512xf32>, i32 -> vector<3x512xf32>
    %c511_i32_21 = arith.constant 511 : i32
    %35 = tpu.dynamic_rotate %30 by %c511_i32_21 dim 1 : vector<3x512xf32>, i32 -> vector<3x512xf32>
    %c497_i32_22 = arith.constant 497 : i32
    %36 = tpu.dynamic_rotate %30 by %c497_i32_22 dim 1 : vector<3x512xf32>, i32 -> vector<3x512xf32>
    %c496_i32_23 = arith.constant 496 : i32
    %37 = tpu.dynamic_rotate %30 by %c496_i32_23 dim 1 : vector<3x512xf32>, i32 -> vector<3x512xf32>
    %c495_i32_24 = arith.constant 495 : i32
    %38 = tpu.dynamic_rotate %30 by %c495_i32_24 dim 1 : vector<3x512xf32>, i32 -> vector<3x512xf32>
    %39 = tpu.concatenate %31, %32, %33, %34, %30, %35, %36, %37, %38 in 0 : vector<3x512xf32>, vector<3x512xf32>, vector<3x512xf32>, vector<3x512xf32>, vector<3x512xf32>, vector<3x512xf32>, vector<3x512xf32>, vector<3x512xf32>, vector<3x512xf32> -> vector<27x512xf32>
    %40 = arith.mulf %39, %4 : vector<27x512xf32>
    %cst_25 = arith.constant dense<0.000000e+00> : vector<3x512xf32>
    %41 = tpu.matmul %0, %40, %cst_25 {dimension_numbers = #tpu.dot_dimension_numbers<[1], [0], [0], [1], [0, 0, 1, 1], [], []>, precision = #tpu.contract_precision<fp32>} : vector<3x27xf32>, vector<27x512xf32>, vector<3x512xf32> -> vector<3x512xf32>
    %42 = arith.addf %41, %3 : vector<3x512xf32>
    %c17_i32_26 = arith.constant 17 : i32
    %43 = tpu.dynamic_rotate %42 by %c17_i32_26 dim 1 : vector<3x512xf32>, i32 -> vector<3x512xf32>
    %c16_i32_27 = arith.constant 16 : i32
    %44 = tpu.dynamic_rotate %42 by %c16_i32_27 dim 1 : vector<3x512xf32>, i32 -> vector<3x512xf32>
    %c15_i32_28 = arith.constant 15 : i32
    %45 = tpu.dynamic_rotate %42 by %c15_i32_28 dim 1 : vector<3x512xf32>, i32 -> vector<3x512xf32>
    %c1_i32_29 = arith.constant 1 : i32
    %46 = tpu.dynamic_rotate %42 by %c1_i32_29 dim 1 : vector<3x512xf32>, i32 -> vector<3x512xf32>
    %c511_i32_30 = arith.constant 511 : i32
    %47 = tpu.dynamic_rotate %42 by %c511_i32_30 dim 1 : vector<3x512xf32>, i32 -> vector<3x512xf32>
    %c497_i32_31 = arith.constant 497 : i32
    %48 = tpu.dynamic_rotate %42 by %c497_i32_31 dim 1 : vector<3x512xf32>, i32 -> vector<3x512xf32>
    %c496_i32_32 = arith.constant 496 : i32
    %49 = tpu.dynamic_rotate %42 by %c496_i32_32 dim 1 : vector<3x512xf32>, i32 -> vector<3x512xf32>
    %c495_i32_33 = arith.constant 495 : i32
    %50 = tpu.dynamic_rotate %42 by %c495_i32_33 dim 1 : vector<3x512xf32>, i32 -> vector<3x512xf32>
    %51 = tpu.concatenate %43, %44, %45, %46, %42, %47, %48, %49, %50 in 0 : vector<3x512xf32>, vector<3x512xf32>, vector<3x512xf32>, vector<3x512xf32>, vector<3x512xf32>, vector<3x512xf32>, vector<3x512xf32>, vector<3x512xf32>, vector<3x512xf32> -> vector<27x512xf32>
    %52 = arith.mulf %51, %4 : vector<27x512xf32>
    %cst_34 = arith.constant dense<0.000000e+00> : vector<3x512xf32>
    %53 = tpu.matmul %0, %52, %cst_34 {dimension_numbers = #tpu.dot_dimension_numbers<[1], [0], [0], [1], [0, 0, 1, 1], [], []>, precision = #tpu.contract_precision<fp32>} : vector<3x27xf32>, vector<27x512xf32>, vector<3x512xf32> -> vector<3x512xf32>
    %54 = arith.addf %53, %3 : vector<3x512xf32>
    %c0_35 = arith.constant 0 : index
    %c0_36 = arith.constant 0 : index
    %c0_37 = arith.constant 0 : index
    %55 = vector.load %arg5[%c0_35, %c0_36, %c0_37] : memref<1x3x512xf32, #tpu.memory_space<vmem>>, vector<1x3x512xf32>
    %56 = vector.shape_cast %55 : vector<1x3x512xf32> to vector<3x512xf32>
    %57 = vector.shape_cast %54 : vector<3x512xf32> to vector<1x3x512xf32>
    tpu.vector_store %arg5[%c0_35, %c0_36, %c0_37], %57 {strides = array<i32>} : memref<1x3x512xf32, #tpu.memory_space<vmem>>, vector<1x3x512xf32>,
    return
  }
  func.func @transform_0(%arg0: i32) -> (i32, i32) {
    %c0_i32 = arith.constant 0 : i32
    %c0_i32_0 = arith.constant 0 : i32
    %c0_i32_1 = arith.constant 0 : i32
    return %c0_i32, %c0_i32_0 : i32, i32
  }
  func.func @transform_1(%arg0: i32) -> (i32, i32) {
    %c0_i32 = arith.constant 0 : i32
    %c0_i32_0 = arith.constant 0 : i32
    %c0_i32_1 = arith.constant 0 : i32
    return %c0_i32, %c0_i32_0 : i32, i32
  }
  func.func @transform_2(%arg0: i32) -> (i32, i32) {
    %c0_i32 = arith.constant 0 : i32
    %c0_i32_0 = arith.constant 0 : i32
    %c0_i32_1 = arith.constant 0 : i32
    return %c0_i32, %c0_i32_0 : i32, i32
  }
  func.func @transform_3(%arg0: i32) -> (i32, i32, i32) {
    %c0_i32 = arith.constant 0 : i32
    %c0_i32_0 = arith.constant 0 : i32
    %c0_i32_1 = arith.constant 0 : i32
    return %arg0, %c0_i32, %c0_i32_0 : i32, i32, i32
  }
  func.func @transform_4(%arg0: i32) -> (i32, i32, i32) {
    %c0_i32 = arith.constant 0 : i32
    %c0_i32_0 = arith.constant 0 : i32
    %c0_i32_1 = arith.constant 0 : i32
    return %arg0, %c0_i32, %c0_i32_0 : i32, i32, i32
  }
}

</mosaic_0001>

<bundles_post_ra>
// kernel: vanilla_model_pallas.1
= control target key start
LH: loop header
LB: loop body
LE: loop exit
PB: predicated region body
PF: predicated region fallthrough
CT: control target
= control target key end

     0   :  { %s5874_s19 = smov 15   ;;  %s5875_s20 = smov 1   ;;  %v7933_v4 = vmov 0.0   ;;  %v5883_v5 = vmov 0   ;;  %v56_v13 = vlaneseq  ;;  %vm240_vm2 = vcmask 1040384   ;;  %s7921_s3 = inlined_call_operand.vmem [shape: f32[1,3,512], index: 3, kind: input, shape index: {}]   ;;  %s7922_s1 = inlined_call_operand.vmem [shape: f32[3,1], index: 1, kind: input, shape index: {}]   ;;  %s7923_s0 = inlined_call_operand.vmem [shape: f32[3,27], index: 0, kind: input, shape index: {}]   ;;  %s7924_s2 = inlined_call_operand.vmem [shape: f32[27,512], index: 2, kind: input, shape index: {}]   ;;  %s7925_s4 = inlined_call_operand.vmem [shape: f32[1,3,512], index: 4, kind: output, shape index: {}]  }
   0x1   :  { %v5912_v0 = vld [vmem:[%s7921_s3 + $0x8] sm:$0x77]  ;;  %v5917_v1 = vld [vmem:[%s7921_s3] sm:$0x77]  ;;  %s5876_s3 = smov 16   ;;  %s5877_s21 = smov 127   ;;  %369 = vmatprep.mubr.f32.mxu0 %v7933_v4  ;;  %912 = vmatprep.mubr.f32.mxu1 %v7933_v4 }
   0x2   :  { %80 = vrot.lane.b32.xlu1 %v5912_v0, %s5874_s19  ;;  %76 = vrot.lane.b32.xlu0 %v5917_v1, %s5874_s19  ;;  %v45_v2 = vcombine.high %v5912_v0, %v5912_v0  ;;  %v44_v3 = vcombine.high %v5917_v1, %v5917_v1  ;;  %s5878_s22 = smov 17   ;;  %s5879_s23 = smov 113   ;;  %v18_v6 = vld [vmem:[%s7922_s1] sm:$0x7]  ;;  %v5976_v16 = vand.u32 127, %v56_v13  ;;  %vm281_vm3 = vcmask 220160  }
   0x3   :  { %s5880_s24 = smov 112   ;;  %s5881_s25 = smov 111   ;;  %5853 = vset.pattern.permute.xlu0 %v5883_v5  ;;  %v17_v29 = vld [vmem:[%s7923_s0] sm:$0x7]  ;;  %v190_v31 = vcombine.low %v5917_v1, %v5917_v1  ;;  %vm245_vm5 = vcmask 1043456   ;;  %v191_v39 = vcombine.low %v5912_v0, %v5912_v0  ;;  %vm250_vm7 = vcmask 1046528  }
   0x4   :  { %vm97_vm0 = vcmp.lt.s32.totalorder %v5976_v16, 1  ;;  %vm84_vm1 = vcmp.lt.s32.totalorder %v5976_v16, 15  ;;  %vm110_vm4 = vcmp.lt.s32.totalorder %v5976_v16, 127  ;;  %vm71_vm6 = vcmp.lt.s32.totalorder %v5976_v16, 16  ;;  %v6061_v59 = vld [vmem:[%s7924_s2 + $0x20] sm:$0xff] }
   0x5   :  { %v283_v40 = vsel %vm281_vm3, %v17_v29, 0  ;;  %vm58_vm8 = vcmp.lt.s32.totalorder %v5976_v16, 17  ;;  %vm230_vm9 = vcmask 1042432   ;;  %vm235_vm10 = vcmask 1045504  }
   0x6   :  { %82 = vrot.lane.b32.xlu1 %v45_v2, %s5874_s19  ;;  %78 = vrot.lane.b32.xlu0 %v44_v3, %s5874_s19  ;;  %v6032_v48 = vand.u32 4294901760, %v283_v40  ;;  %vm123_vm11 = vcmp.lt.s32.totalorder %v5976_v16, 113  ;;  %vm255_vm12 = vcmask 1041408   ;;  %vm136_vm13 = vcmp.lt.s32.totalorder %v5976_v16, 112 }
   0x7   :  { %vm260_vm14 = vcmask 1044480   ;;  %vm149_vm15 = vcmp.lt.s32.totalorder %v5976_v16, 111 }
   0xa   :  { %91 = vrot.lane.b32.xlu1 %v44_v3, %s5875_s20  ;;  %89 = vrot.lane.b32.xlu0 %v5917_v1, %s5875_s20 }
   0xe   :  { %95 = vrot.lane.b32.xlu1 %v45_v2, %s5875_s20  ;;  %93 = vrot.lane.b32.xlu0 %v5912_v0, %s5875_s20 }
  0x12   :  { %65 = vrot.lane.b32.xlu1 %v44_v3, %s5876_s3  ;;  %63 = vrot.lane.b32.xlu0 %v5917_v1, %s5876_s3 }
  0x16   :  { %69 = vrot.lane.b32.xlu1 %v45_v2, %s5876_s3  ;;  %67 = vrot.lane.b32.xlu0 %v5912_v0, %s5876_s3 }
  0x1a   :  { %104 = vrot.lane.b32.xlu1 %v44_v3, %s5877_s21  ;;  %102 = vrot.lane.b32.xlu0 %v5917_v1, %s5877_s21 }
  0x1e   :  { %108 = vrot.lane.b32.xlu1 %v45_v2, %s5877_s21  ;;  %106 = vrot.lane.b32.xlu0 %v5912_v0, %s5877_s21 }
  0x22   :  { %50 = vrot.lane.b32.xlu1 %v44_v3, %s5878_s22  ;;  %48 = vrot.lane.b32.xlu0 %v5917_v1, %s5878_s22 }
  0x26   :  { %54 = vrot.lane.b32.xlu1 %v45_v2, %s5878_s22  ;;  %52 = vrot.lane.b32.xlu0 %v5912_v0, %s5878_s22 }
  0x2a   :  { %117 = vrot.lane.b32.xlu1 %v44_v3, %s5879_s23  ;;  %115 = vrot.lane.b32.xlu0 %v5917_v1, %s5879_s23 }
  0x2e   :  { %121 = vrot.lane.b32.xlu1 %v45_v2, %s5879_s23  ;;  %119 = vrot.lane.b32.xlu0 %v5912_v0, %s5879_s23 }
  0x32   :  { %130 = vrot.lane.b32.xlu1 %v44_v3, %s5880_s24  ;;  %128 = vrot.lane.b32.xlu0 %v5917_v1, %s5880_s24 }
  0x36   :  { %134 = vrot.lane.b32.xlu1 %v45_v2, %s5880_s24  ;;  %132 = vrot.lane.b32.xlu0 %v5912_v0, %s5880_s24 }
  0x3a   :  { %143 = vrot.lane.b32.xlu1 %v44_v3, %s5881_s25  ;;  %141 = vrot.lane.b32.xlu0 %v5917_v1, %s5881_s25 }
  0x3e   :  { %147 = vrot.lane.b32.xlu1 %v45_v2, %s5881_s25  ;;  %145 = vrot.lane.b32.xlu0 %v5912_v0, %s5881_s25  ;;  %v6076_v2 = vld [vmem:[%s7924_s2 + $0x38] sm:$0xff] }
  0x42   :  { %21 = vperm.xlu0 %5853, %v18_v6  }
  0x74   :  { %v81_v7 = vpop.permute.xlu1 %80  ;;  %v77_v8 = vpop.permute.xlu0 %76 }
  0x78   :  { %v83_v9 = vpop.permute.xlu1 %82  ;;  %v79_v10 = vpop.permute.xlu0 %78 }
  0x79   :  { %v5988_v21 = vsel %vm84_vm1, %v83_v9, %v77_v8  ;;  %v5992_v22 = vsel %vm84_vm1, %v77_v8, %v79_v10  ;;  %v6003_v30 = vsel %vm84_vm1, %v81_v7, %v83_v9  ;;  %v6011_v33 = vsel %vm84_vm1, %v79_v10, %v81_v7 }
  0x7a   :  { %v170_v32 = vrot.slane %v5988_v21, 2  ;;  %v171_v34 = vrot.slane %v5992_v22, 2  ;;  %v173_v41 = vrot.slane %v6003_v30, 2  ;;  %v172_v45 = vrot.slane %v6011_v33, 2 }
  0x7b   :  { %v6113_v22 = vsub.f32 %v283_v40, %v6032_v48  ;;  %v6132_v40 = vld [vmem:[%s7924_s2 + $0x18] sm:$0xff] }
  0x7c   :  { %v92_v11 = vpop.permute.xlu1 %91  ;;  %v90_v12 = vpop.permute.xlu0 %89 }
  0x7d   :  { %v100_v19 = vsel %vm97_vm0, %v90_v12, %v92_v11  ;;  %v6163_v30 = vand.u32 4294901760, %v6113_v22 }
  0x7e   :  { %v183_v26 = vrot.slane %v100_v19, 7  ;;  %v6108_v19 = vld [vmem:[%s7924_s2 + $0x30] sm:$0xff] }
  0x80   :  { %v96_v14 = vpop.permute.xlu1 %95  ;;  %v94_v15 = vpop.permute.xlu0 %93  ;;  %v242_v42 = vsel %vm240_vm2, %v171_v34, %v183_v26 }
  0x81   :  { %v101_v20 = vsel %vm97_vm0, %v96_v14, %v90_v12  ;;  %v98_v23 = vsel %vm97_vm0, %v94_v15, %v96_v14  ;;  %v99_v28 = vsel %vm97_vm0, %v92_v11, %v94_v15  ;;  %v247_v53 = vsel %vm245_vm5, %v242_v42, %v5917_v1  ;;  %v6071_v1 = vld [vmem:[%s7924_s2 + $0x28] sm:$0xff] }
  0x82   :  { %v182_v27 = vrot.slane %v101_v20, 7  ;;  %v185_v35 = vrot.slane %v98_v23, 7  ;;  %v184_v36 = vrot.slane %v99_v28, 7  ;;  %v6101_v15 = vld [vmem:[%s7924_s2 + $0x8] sm:$0xff] }
  0x84   :  { %v5979_v17 = vpop.permute.xlu1 %65  ;;  %v64_v18 = vpop.permute.xlu0 %63  ;;  %v241_v43 = vsel %vm240_vm2, %v170_v32, %v182_v27  ;;  %v244_v47 = vsel %vm240_vm2, %v173_v41, %v185_v35  ;;  %v243_v49 = vsel %vm240_vm2, %v172_v45, %v184_v36 }
  0x85   :  { %v74_v50 = vsel %vm71_vm6, %v64_v18, %v5979_v17  ;;  %v246_v51 = vsel %vm245_vm5, %v241_v43, %v190_v31  ;;  %v249_v61 = vsel %vm245_vm5, %v244_v47, %v5912_v0  ;;  %v248_v6 = vsel %vm245_vm5, %v243_v49, %v191_v39 }
  0x86   :  { %v159_v3 = vrot.slane %v74_v50, 5 }
  0x88   :  { %v70_v24 = vpop.permute.xlu1 %69  ;;  %v68_v25 = vpop.permute.xlu0 %67 }
  0x89   :  { %v75_v5 = vsel %vm71_vm6, %v70_v24, %v64_v18  ;;  %v72_v0 = vsel %vm71_vm6, %v68_v25, %v70_v24  ;;  %v73_v7 = vsel %vm71_vm6, %v5979_v17, %v68_v25 }
  0x8a   :  { %v158_v23 = vrot.slane %v75_v5, 5  ;;  %v160_v24 = vrot.slane %v73_v7, 5  ;;  %v161_v27 = vrot.slane %v72_v0, 5 }
  0x8c   :  { %v105_v37 = vpop.permute.xlu1 %104  ;;  %v103_v38 = vpop.permute.xlu0 %102 }
  0x8d   :  { %v6024_v44 = vsel %vm110_vm4, %v103_v38, %v105_v37 }
  0x8e   :  { %v198_v46 = vrot.slane %v6024_v44, 1 }
  0x90   :  { %v109_v52 = vpop.permute.xlu1 %108  ;;  %v107_v54 = vpop.permute.xlu0 %106  ;;  %v251_v55 = vsel %vm250_vm7, %v246_v51, %v198_v46  ;;  %v6140_v51 = vld [vmem:[%s7924_s2 + $0x10] sm:$0xff] }
  0x91   :  { %v6048_v56 = vsel %vm110_vm4, %v109_v52, %v103_v38  ;;  %v6052_v57 = vsel %vm110_vm4, %v107_v54, %v109_v52  ;;  %v6056_v58 = vsel %vm110_vm4, %v105_v37, %v107_v54  ;;  %v269_v12 = vmul.f32 %v251_v55, %v6061_v59 }
  0x92   :  { %v201_v60 = vrot.slane %v6048_v56, 1  ;;  %v199_v62 = vrot.slane %v6056_v58, 1  ;;  %v200_v63 = vrot.slane %v6052_v57, 1 }
  0x93   :  { %v303_v35 = vand.u32 4294901760, %v269_v12 }
  0x94   :  { %v254_v8 = vsel %vm250_vm7, %v249_v61, %v201_v60  ;;  %v252_v9 = vsel %vm250_vm7, %v247_v53, %v199_v62  ;;  %v51_v10 = vpop.permute.xlu1 %50  ;;  %v49_v11 = vpop.permute.xlu0 %48  ;;  %v253_v13 = vsel %vm250_vm7, %v248_v6, %v200_v63 }
  0x95   :  { %v61_v14 = vsel %vm58_vm8, %v49_v11, %v51_v10  ;;  %v270_v17 = vmul.f32 %v252_v9, %v6071_v1  ;;  %v272_v18 = vmul.f32 %v254_v8, %v6076_v2  ;;  %v271_v36 = vmul.f32 %v253_v13, %v6108_v19 }
  0x96   :  { %v232_v20 = vsel %vm230_vm9, %v61_v14, %v159_v3  ;;  %v6159_v6 = vsub.f32 %v269_v12, %v303_v35 }
  0x97   :  { %v237_v25 = vsel %vm235_vm10, %v232_v20, %v171_v34  ;;  %v301_v26 = vand.u32 4294901760, %v270_v17  ;;  %v6127_v34 = vld [vmem:[%s7924_s2] sm:$0xff]  ;;  %v844_v42 = vand.u32 4294901760, %v272_v18  ;;  %v846_v9 = vand.u32 4294901760, %v271_v36 }
  0x98   :  { %v55_v28 = vpop.permute.xlu1 %54  ;;  %v53_v29 = vpop.permute.xlu0 %52  ;;  %v266_v31 = vmul.f32 %v237_v25, %v6101_v15  ;;  %v373_v25 = vsub.f32 %v6113_v22, %v6163_v30 }
  0x99   :  { %v62_v37 = vsel %vm58_vm8, %v55_v28, %v49_v11  ;;  %v59_v38 = vsel %vm58_vm8, %v53_v29, %v55_v28  ;;  %v60_v39 = vsel %vm58_vm8, %v51_v10, %v53_v29  ;;  %v6151_v55 = vsub.f32 %v270_v17, %v301_v26 }
  0x9a   :  { %v231_v43 = vsel %vm230_vm9, %v62_v37, %v158_v23  ;;  %v233_v47 = vsel %vm230_vm9, %v60_v39, %v160_v24  ;;  %v234_v49 = vsel %vm230_vm9, %v59_v38, %v161_v27  ;;  %v297_v50 = vand.u32 4294901760, %v266_v31 }
  0x9b   :  { %v236_v52 = vsel %vm235_vm10, %v231_v43, %v170_v32  ;;  %v238_v53 = vsel %vm235_vm10, %v233_v47, %v172_v45  ;;  %v239_v54 = vsel %vm235_vm10, %v234_v49, %v173_v41  ;;  %v7931_v10 = vand.u32 4294901760, %v6151_v55 }
  0x9c   :  { %v118_v61 = vpop.permute.xlu1 %117  ;;  %v116_v3 = vpop.permute.xlu0 %115  ;;  %v6153_v5 = vpack.c.bf16 %v301_v26, %v297_v50  ;;  %v6155_v0 = vsub.f32 %v266_v31, %v297_v50  ;;  %v265_v21 = vmul.f32 %v236_v52, %v6127_v34  ;;  %v268_v32 = vmul.f32 %v239_v54, %v6132_v40 }
  0x9d   :  { %v267_v33 = vmul.f32 %v238_v53, %v6140_v51  ;;  %v126_v7 = vsel %vm123_vm11, %v116_v3, %v118_v61  ;;  %v6173_v17 = vsub.f32 %v272_v18, %v844_v42  ;;  %v7926_v26 = vand.u32 4294901760, %v6159_v6 }
  0x9e   :  { %5364 = vmatprep.subr.bf16.mxu0 %v6153_v5  ;;  %v299_v41 = vand.u32 4294901760, %v265_v21  ;;  %v840_v45 = vand.u32 4294901760, %v268_v32  ;;  %v7932_v20 = vand.u32 4294901760, %v6155_v0  ;;  %v210_v27 = vrot.slane %v126_v7, 6 }
  0x9f   :  { %v842_v8 = vand.u32 4294901760, %v267_v33  ;;  %v396_v31 = vsub.f32 %v6151_v55, %v7931_v10  ;;  %v7928_v43 = vand.u32 4294901760, %v6173_v17  ;;  %v6201_v47 = vsub.f32 %v271_v36, %v846_v9  ;;  %v6220_v36 = vld [vmem:[%s7924_s2 + $0x40] sm:$0xff] }
  0xa0   :  { %v122_v11 = vpop.permute.xlu1 %121  ;;  %v120_v12 = vpop.permute.xlu0 %119  ;;  %v6169_v13 = vpack.c.bf16 %v303_v35, %v299_v41  ;;  %v6171_v14 = vpack.c.bf16 %v844_v42, %v840_v45  ;;  %v6185_v18 = vsub.f32 %v268_v32, %v840_v45  ;;  %v384_v42 = vsub.f32 %v6155_v0, %v7932_v20 }
  0xa1   :  { %v127_v23 = vsel %vm123_vm11, %v122_v11, %v116_v3  ;;  %v125_v24 = vsel %vm123_vm11, %v118_v61, %v120_v12  ;;  %v6187_v28 = vpack.c.bf16 %v846_v9, %v842_v8  ;;  %v124_v35 = vsel %vm123_vm11, %v120_v12, %v122_v11 }
  0xa2   :  { %5366 = vmatpush1.bf16.msra.mxu0 %v6169_v13  ;;  %5412 = vmatprep.subr.bf16.mxu1 %v6171_v14  ;;  %v213_v29 = vrot.slane %v127_v23, 6  ;;  %v211_v37 = vrot.slane %v125_v24, 6  ;;  %v6205_v50 = vand.u32 4294901760, %v373_v25  ;;  %v6210_v52 = vsub.f32 %v6159_v6, %v7926_v26  ;;  %v6247_v24 = vld [vmem:[%s7924_s2 + $0x48] sm:$0xff]  ;;  %v6252_v25 = vld [vmem:[%s7924_s2 + $0x58] sm:$0xff] }
  0xa3   :  { %5414 = vmatpush1.bf16.msra.mxu1 %v6187_v28  ;;  %v256_v53 = vsel %vm255_vm12, %v198_v46, %v210_v27  ;;  %v6215_v54 = vsub.f32 %v265_v21, %v299_v41  ;;  %v7930_v3 = vand.u32 4294901760, %v6185_v18  ;;  %v212_v45 = vrot.slane %v124_v35, 6 }
  0xa4   :  { %v131_v38 = vpop.permute.xlu1 %130  ;;  %v129_v39 = vpop.permute.xlu0 %128  ;;  %v259_v32 = vsel %vm255_vm12, %v201_v60, %v213_v29  ;;  %v6226_v7 = vsub.f32 %v267_v33, %v842_v8  ;;  %v397_v44 = vand.u32 4294901760, %v396_v31  ;;  %v257_v46 = vsel %vm255_vm12, %v199_v62, %v211_v37  ;;  %v6263_v31 = vld [vmem:[%s7924_s2 + $0x60] sm:$0x7]  ;;  %v6269_v37 = vld [vmem:[%s7924_s2 + $0x50] sm:$0xff] }
  0xa5   :  { %v139_v49 = vsel %vm136_vm13, %v129_v39, %v131_v38  ;;  %v385_v11 = vand.u32 4294901760, %v384_v42  ;;  %v939_v12 = vsub.f32 %v6173_v17, %v7928_v43  ;;  %v927_v27 = vsub.f32 %v6185_v18, %v7930_v3  ;;  %7966 = vst [vmem:[#allocation2_spill] sm:$0xff] %v6263_v31 }
  0xa6   :  { %v222_v61 = vrot.slane %v139_v49, 3  ;;  %v258_v29 = vsel %vm255_vm12, %v200_v63, %v212_v45 }
  0xa8   :  { %v261_v21 = vsel %vm260_vm14, %v256_v53, %v222_v61  ;;  %v135_v41 = vpop.permute.xlu1 %134  ;;  %v133_v9 = vpop.permute.xlu0 %132  ;;  %v940_v61 = vand.u32 4294901760, %v939_v12  ;;  %v5371_v12 = vpack.c.bf16 %v397_v44, %v385_v11 }
  0xa9   :  { %v140_v56 = vsel %vm136_vm13, %v135_v41, %v129_v39  ;;  %v137_v60 = vsel %vm136_vm13, %v133_v9, %v135_v41  ;;  %v138_v58 = vsel %vm136_vm13, %v131_v38, %v133_v9  ;;  %v6242_v62 = vmul.f32 %v261_v21, %v6220_v36 }
  0xaa   :  { %v225_v33 = vrot.slane %v140_v56, 3  ;;  %v223_v8 = vrot.slane %v138_v58, 3  ;;  %v224_v23 = vrot.slane %v137_v60, 3  ;;  %v7927_v38 = vand.u32 4294901760, %v6215_v54  ;;  %v6293_v58 = vld [vmem:[%s7924_s2 + $0x68] sm:$0x7] }
  0xab   :  { %v307_v35 = vand.u32 4294901760, %v6242_v62  ;;  %v7929_v39 = vand.u32 4294901760, %v6226_v7  ;;  %v928_v60 = vand.u32 4294901760, %v927_v27  ;;  %7968 = vst [vmem:[#allocation4_spill] sm:$0xff] %v6293_v58 }
  0xac   :  { %v264_v57 = vsel %vm260_vm14, %v259_v32, %v225_v33  ;;  %v262_v63 = vsel %vm260_vm14, %v257_v46, %v223_v8  ;;  %v263_v42 = vsel %vm260_vm14, %v258_v29, %v224_v23  ;;  %v144_v49 = vpop.permute.xlu1 %143  ;;  %v142_v53 = vpop.permute.xlu0 %141  ;;  %v6287_v32 = vld [vmem:[%s7924_s2 + $0x78] sm:$0x7]  ;;  %v390_v23 = vsub.f32 %v6215_v54, %v7927_v38 }
  0xad   :  { %v152_v45 = vsel %vm149_vm15, %v142_v53, %v144_v49  ;;  %v274_v21 = vmul.f32 %v262_v63, %v6247_v24  ;;  %v276_v41 = vmul.f32 %v264_v57, %v6252_v25  ;;  %v6281_v9 = vsub.f32 %v6242_v62, %v307_v35  ;;  %7967 = vst [vmem:[#allocation3_spill] sm:$0xff] %v6287_v32  ;;  %v6298_v62 = vld [vmem:[%s7924_s2 + $0x70] sm:$0x7] }
  0xae   :  { %v277_v56 = vmul.f32 %v152_v45, %v6263_v31  ;;  %v275_v46 = vmul.f32 %v263_v42, %v6269_v37  ;;  %7969 = vst [vmem:[#allocation5_spill] sm:$0xff] %v6298_v62  ;;  %v933_v44 = vsub.f32 %v6226_v7, %v7929_v39  ;;  %v5419_v4 = vpack.c.bf16 %v940_v61, %v928_v60 }
  0xaf   :  { %v305_v33 = vand.u32 4294901760, %v274_v21  ;;  %v848_v8 = vand.u32 4294901760, %v276_v41  ;;  %v391_v42 = vand.u32 4294901760, %v390_v23  ;;  %v7971_v23 = vand.u32 4294901760, %v6281_v9 }
  0xb0   :  { %v286_v11 = vsel %vm230_vm9, %v277_v56, 0  ;;  %v148_v27 = vpop.permute.xlu1 %147  ;;  %v146_v29 = vpop.permute.xlu0 %145  ;;  %v850_v57 = vand.u32 4294901760, %v275_v46 }
  0xb1   :  { %v153_v45 = vsel %vm149_vm15, %v148_v27, %v142_v53  ;;  %v150_v26 = vsel %vm149_vm15, %v146_v29, %v148_v27  ;;  %v151_v38 = vsel %vm149_vm15, %v144_v49, %v146_v29  ;;  %v6315_v43 = vsub.f32 %v274_v21, %v305_v33 }
  0xb2   :  { %v280_v56 = vmul.f32 %v153_v45, %v6287_v32  ;;  %v278_v39 = vmul.f32 %v151_v38, %v6293_v58  ;;  %v279_v3 = vmul.f32 %v150_v26, %v6298_v62  ;;  %v6320_v10 = vsub.f32 %v276_v41, %v848_v8 }
  0xb3   :  { %v311_v20 = vand.u32 4294901760, %v286_v11  ;;  %v934_v53 = vand.u32 4294901760, %v933_v44  ;;  %v6326_v38 = vsub.f32 %v275_v46, %v850_v57  ;;  %v7970_v41 = vand.u32 4294901760, %v6201_v47 }
  0xb4   :  { %v295_v63 = vsel %vm230_vm9, %v280_v56, 0  ;;  %v289_v27 = vsel %vm230_vm9, %v278_v39, 0  ;;  %v292_v49 = vsel %vm230_vm9, %v279_v3, 0  ;;  %v414_v39 = vsub.f32 %v6281_v9, %v7971_v23 }
  0xb5   :  { %v309_v29 = vand.u32 4294901760, %v289_v27  ;;  %v854_v45 = vand.u32 4294901760, %v292_v49  ;;  %v852_v32 = vand.u32 4294901760, %v295_v63  ;;  %v6328_v26 = vsub.f32 %v286_v11, %v311_v20 }
  0xb6   :  { %v945_v61 = vsub.f32 %v6201_v47, %v7970_v41  ;;  %v6347_v21 = vpack.c.bf16 %v311_v20, %v307_v35  ;;  %v7972_v41 = vand.u32 4294901760, %v6315_v43  ;;  %v403_v20 = vand.u32 4294901760, %v6210_v52 }
  0xb7   :  { %v6337_v3 = vsub.f32 %v289_v27, %v309_v29  ;;  %v6339_v44 = vsub.f32 %v292_v49, %v854_v45  ;;  %v6341_v56 = vpack.c.bf16 %v309_v29, %v305_v33  ;;  %v6343_v46 = vpack.c.bf16 %v852_v32, %v848_v8 }
  0xb8   :  { %v6345_v11 = vsub.f32 %v295_v63, %v852_v32  ;;  %v6349_v62 = vpack.c.bf16 %v854_v45, %v850_v57  ;;  %v408_v60 = vsub.f32 %v6315_v43, %v7972_v41  ;;  %v7937_v8 = vand.u32 4294901760, %v6328_v26 }
  0xb9   :  { %v7941_v23 = vand.u32 4294901760, %v6339_v44  ;;  %5368 = vmatprep.subr.bf16.mxu0 %v6341_v56  ;;  %5416 = vmatprep.subr.bf16.mxu1 %v6343_v46  ;;  %v7938_v33 = vand.u32 4294901760, %v6337_v3  ;;  %v7939_v32 = vand.u32 4294901760, %v6326_v38  ;;  %v946_v35 = vand.u32 4294901760, %v945_v61 }
  0xba   :  { %5370 = vmatpush1.bf16.msra.mxu0 %v6347_v21  ;;  %5418 = vmatpush1.bf16.msra.mxu1 %v6349_v62  ;;  %v7973_v57 = vand.u32 4294901760, %v6320_v10  ;;  %v7940_v27 = vand.u32 4294901760, %v6345_v11  ;;  %v426_v29 = vsub.f32 %v6328_v26, %v7937_v8  ;;  %v5373_v45 = vpack.c.bf16 %v403_v20, %v391_v42 }
  0xbb   :  { %5372 = vmatprep.subr.bf16.mxu0 %v5371_v12  ;;  %5420 = vmatprep.subr.bf16.mxu1 %v5419_v4  ;;  %v420_v49 = vsub.f32 %v6337_v3, %v7938_v33  ;;  %v957_v52 = vsub.f32 %v6326_v38, %v7939_v32  ;;  %v5421_v61 = vpack.c.bf16 %v946_v35, %v934_v53  ;;  %v409_v12 = vand.u32 4294901760, %v408_v60 }
  0xbc   :  { %v951_v63 = vsub.f32 %v6320_v10, %v7973_v57  ;;  %v963_v41 = vsub.f32 %v6345_v11, %v7940_v27  ;;  %v969_v4 = vsub.f32 %v6339_v44, %v7941_v23  ;;  %v415_v8 = vand.u32 4294901760, %v414_v39 }
  0xbd   :  { %375 = vmatmul.mubr.f32.vlgmr.msra.gmra.mrb[0].mxu0 %v6205_v50  ;;  %918 = vmatmul.mubr.f32.vlgmr.msra.gmra.mrb[0].mxu1 %v6205_v50  ;;  %v421_v57 = vand.u32 4294901760, %v420_v49  ;;  %v427_v33 = vand.u32 4294901760, %v426_v29  ;;  %v958_v20 = vand.u32 4294901760, %v957_v52  ;;  %v7974_v27 = vmov 0.0  }
  0xbe   :  { %5374 = vmatpush1.bf16.msra.mxu0 %v5373_v45  ;;  %5422 = vmatpush1.bf16.msra.mxu1 %v5421_v61  ;;  %v952_v42 = vand.u32 4294901760, %v951_v63  ;;  %v964_v53 = vand.u32 4294901760, %v963_v41  ;;  %v970_v35 = vand.u32 4294901760, %v969_v4  ;;  %v5379_v60 = vpack.c.bf16 %v6151_v55, %v6155_v0 }
  0xbf   :  { %v5375_v32 = vpack.c.bf16 %v421_v57, %v409_v12  ;;  %485 = vmatprep.mubr.f32.mxu0 %v7974_v27  ;;  %1028 = vmatprep.mubr.f32.mxu1 %v7974_v27  ;;  %v5377_v31 = vpack.c.bf16 %v427_v33, %v415_v8  ;;  %v5427_v39 = vpack.c.bf16 %v6173_v17, %v6185_v18  ;;  %v7976_v49 = vand.u32 4294901760, %v6151_v55 }
  0xc0   :  { %v5423_v23 = vpack.c.bf16 %v964_v53, %v952_v42  ;;  %v5425_v58 = vpack.c.bf16 %v970_v35, %v958_v20  ;;  %v5381_v63 = vpack.c.bf16 %v6159_v6, %v6215_v54  ;;  %v5429_v33 = vpack.c.bf16 %v6201_v47, %v6226_v7 }
  0xc1   :  { %5376 = vmatprep.subr.bf16.mxu0 %v5375_v32  ;;  %v5383_v8 = vpack.c.bf16 %v6337_v3, %v6315_v43  ;;  %v7975_v32 = vand.u32 4294901760, %v6155_v0  ;;  %v7977_v52 = vand.u32 4294901760, %v6185_v18  ;;  %v7978_v45 = vand.u32 4294901760, %v6173_v17 }
  0xc2   :  { %5424 = vmatprep.subr.bf16.mxu1 %v5423_v23  ;;  %5378 = vmatpush1.bf16.msra.mxu0 %v5377_v31  ;;  %v5431_v31 = vpack.c.bf16 %v6345_v11, %v6320_v10  ;;  %v5433_v23 = vpack.c.bf16 %v6339_v44, %v6326_v38  ;;  %v7979_v41 = vand.u32 4294901760, %v6215_v54  ;;  %v7980_v0 = vand.u32 4294901760, %v6159_v6 }
  0xc3   :  { %5426 = vmatpush1.bf16.msra.mxu1 %v5425_v58  ;;  %5380 = vmatprep.subr.bf16.mxu0 %v5379_v60  ;;  %v5385_v58 = vpack.c.bf16 %v6328_v26, %v6281_v9  ;;  %v5395_v29 = vpack.c.bf16 %v7976_v49, %v7975_v32  ;;  %v5443_v61 = vpack.c.bf16 %v7978_v45, %v7977_v52  ;;  %v7981_v55 = vand.u32 4294901760, %v6226_v7 }
  0xc4   :  { %5428 = vmatprep.subr.bf16.mxu1 %v5427_v39  ;;  %v5397_v4 = vpack.c.bf16 %v7980_v0, %v7979_v41  ;;  %v7982_v12 = vand.u32 4294901760, %v6201_v47  ;;  %v7983_v18 = vand.u32 4294901760, %v6315_v43  ;;  %v7984_v17 = vand.u32 4294901760, %v6337_v3 }
  0xc5   :  { %487 = vmatmul.mubr.f32.vlgmr.msra.gmra.mrb[0].mxu0 %v6032_v48  ;;  %v7985_v54 = vand.u32 4294901760, %v6320_v10  ;;  %v7986_v6 = vand.u32 4294901760, %v6345_v11  ;;  %v7987_v7 = vand.u32 4294901760, %v6281_v9  ;;  %v7988_v47 = vand.u32 4294901760, %v6328_v26 }
  0xc6   :  { %1030 = vmatmul.mubr.f32.vlgmr.msra.gmra.mrb[0].mxu1 %v6032_v48  ;;  %5382 = vmatpush1.bf16.msra.mxu0 %v5381_v63  ;;  %v5445_v57 = vpack.c.bf16 %v7982_v12, %v7981_v55  ;;  %v5399_v42 = vpack.c.bf16 %v7984_v17, %v7983_v18  ;;  %v7989_v43 = vand.u32 4294901760, %v6326_v38  ;;  %v7990_v3 = vand.u32 4294901760, %v6339_v44 }
  0xc7   :  { %5430 = vmatpush1.bf16.msra.mxu1 %v5429_v33  ;;  %5384 = vmatprep.subr.bf16.mxu0 %v5383_v8  ;;  %v5447_v53 = vpack.c.bf16 %v7986_v6, %v7985_v54  ;;  %v5401_v20 = vpack.c.bf16 %v7988_v47, %v7987_v7 }
  0xc8   :  { %5432 = vmatprep.subr.bf16.mxu1 %v5431_v31  ;;  %573 = vmatprep.mubr.f32.mxu0 %v7974_v27  ;;  %v5449_v35 = vpack.c.bf16 %v7990_v3, %v7989_v43 }
  0xc9   :  { %1116 = vmatprep.mubr.f32.mxu1 %v7974_v27 }
  0xca   :  { %5386 = vmatpush1.bf16.msra.mxu0 %v5385_v58 }
  0xcb   :  { %5434 = vmatpush1.bf16.msra.mxu1 %v5433_v23  ;;  %5388 = vmatprep.subr.bf16.mxu0 %v6153_v5 }
  0xcc   :  { %5436 = vmatprep.subr.bf16.mxu1 %v6171_v14 }
  0xcd   :  { %576 = vmatmul.mubr.f32.vlgmr.msra.gmra.mrb[0].mxu0 %v6113_v22 }
  0xce   :  { %1119 = vmatmul.mubr.f32.vlgmr.msra.gmra.mrb[0].mxu1 %v6113_v22  ;;  %5390 = vmatpush1.bf16.msra.mxu0 %v6169_v13 }
  0xcf   :  { %5438 = vmatpush1.bf16.msra.mxu1 %v6187_v28  ;;  %5392 = vmatprep.subr.bf16.mxu0 %v6341_v56 }
  0xd0   :  { %5440 = vmatprep.subr.bf16.mxu1 %v6343_v46  ;;  %654 = vmatprep.mubr.f32.mxu0 %v7974_v27 }
  0xd1   :  { %1197 = vmatprep.mubr.f32.mxu1 %v7974_v27 }
  0xd2   :  { %5394 = vmatpush1.bf16.msra.mxu0 %v6347_v21 }
  0xd3   :  { %5442 = vmatpush1.bf16.msra.mxu1 %v6349_v62  ;;  %5396 = vmatprep.subr.bf16.mxu0 %v5395_v29 }
  0xd4   :  { %5444 = vmatprep.subr.bf16.mxu1 %v5443_v61 }
  0xd5   :  { %658 = vmatmul.mubr.f32.vlgmr.msra.gmra.mrb[0].mxu0 %v6163_v30 }
  0xd6   :  { %1201 = vmatmul.mubr.f32.vlgmr.msra.gmra.mrb[0].mxu1 %v6163_v30  ;;  %5398 = vmatpush1.bf16.msra.mxu0 %v5397_v4 }
  0xd7   :  { %5446 = vmatpush1.bf16.msra.mxu1 %v5445_v57  ;;  %5400 = vmatprep.subr.bf16.mxu0 %v5399_v42 }
  0xd8   :  { %5448 = vmatprep.subr.bf16.mxu1 %v5447_v53  ;;  %752 = vmatprep.mubr.f32.mxu0 %v7974_v27 }
  0xd9   :  { %1295 = vmatprep.mubr.f32.mxu1 %v7974_v27 }
  0xda   :  { %5402 = vmatpush1.bf16.msra.mxu0 %v5401_v20 }
  0xdb   :  { %5450 = vmatpush1.bf16.msra.mxu1 %v5449_v35  ;;  %5404 = vmatprep.subr.bf16.mxu0 %v6153_v5  ;;  %v6470_v5 = vpop.permute.xlu0 %21 }
  0xdc   :  { %5452 = vmatprep.subr.bf16.mxu1 %v6171_v14 }
  0xdd   :  { %754 = vmatmul.mubr.f32.vlgmr.msra.gmra.mrb[0].mxu0 %v6032_v48 }
  0xde   :  { %1297 = vmatmul.mubr.f32.vlgmr.msra.gmra.mrb[0].mxu1 %v6032_v48  ;;  %5406 = vmatpush1.bf16.msra.mxu0 %v6169_v13 }
  0xdf   :  { %5454 = vmatpush1.bf16.msra.mxu1 %v6187_v28  ;;  %5408 = vmatprep.subr.bf16.mxu0 %v6341_v56 }
  0xe0   :  { %5456 = vmatprep.subr.bf16.mxu1 %v6343_v46  ;;  %832 = vmatprep.mubr.f32.mxu0 %v7974_v27 }
  0xe1   :  { %1375 = vmatprep.mubr.f32.mxu1 %v7974_v27 }
  0xe2   :  { %5410 = vmatpush1.bf16.msra.mxu0 %v6347_v21 }
  0xe3   :  { %5458 = vmatpush1.bf16.msra.mxu1 %v6349_v62 }
  0xe5   :  { %834 = vmatmul.mubr.f32.vlgmr.msra.gmra.mrb[0].mxu0 %v6032_v48 }
  0xe6   :  { %1377 = vmatmul.mubr.f32.vlgmr.msra.gmra.mrb[0].mxu1 %v6032_v48  ;;  %1691 = vmatprep.mubr.f32.mxu0 %v7974_v27 }
  0xe7   :  { %2234 = vmatprep.mubr.f32.mxu1 %v7974_v27 }
 0x1b8   :  { %v835_v10 = vpop.f32.mrb[0].mxu0 }
 0x1b9   :  { %v6473_v13 = vadd.f32 %v835_v10, %v6470_v5  ;;  %v1378_v14 = vpop.f32.mrb[0].mxu1  ;;  %v837_v28 = vpop.f32.mrb[1].mxu0 }
 0x1ba   :  { %v6476_v9 = vadd.f32 %v1378_v14, %v6470_v5  ;;  %v1380_v62 = vpop.f32.mrb[1].mxu1  ;;  %v6483_v21 = vadd.f32 %v837_v28, %v6470_v5 }
 0x1bb   :  { %1407 = vrot.lane.b32.xlu1 %v6473_v13, %s5874_s19  ;;  %v6490_v38 = vadd.f32 %v1380_v62, %v6470_v5  ;;  %v1519_v43 = vrot.slane %v6473_v13, 4 }
 0x1bc   :  { %1411 = vrot.lane.b32.xlu0 %v6476_v9, %s5874_s19  ;;  %v1520_v7 = vrot.slane %v6483_v21, 4 }
 0x1bf   :  { %1409 = vrot.lane.b32.xlu1 %v6483_v21, %s5874_s19 }
 0x1c0   :  { %1419 = vrot.lane.b32.xlu0 %v6473_v13, %s5875_s20 }
 0x1c3   :  { %1413 = vrot.lane.b32.xlu1 %v6490_v38, %s5874_s19 }
 0x1c4   :  { %1423 = vrot.lane.b32.xlu0 %v6476_v9, %s5875_s20 }
 0x1c7   :  { %1421 = vrot.lane.b32.xlu1 %v6483_v21, %s5875_s20 }
 0x1c8   :  { %1395 = vrot.lane.b32.xlu0 %v6473_v13, %s5876_s3 }
 0x1cb   :  { %1425 = vrot.lane.b32.xlu1 %v6490_v38, %s5875_s20 }
 0x1cc   :  { %1399 = vrot.lane.b32.xlu0 %v6476_v9, %s5876_s3 }
 0x1cf   :  { %1397 = vrot.lane.b32.xlu1 %v6483_v21, %s5876_s3 }
 0x1d0   :  { %1431 = vrot.lane.b32.xlu0 %v6473_v13, %s5877_s21 }
 0x1d3   :  { %1401 = vrot.lane.b32.xlu1 %v6490_v38, %s5876_s3 }
 0x1d4   :  { %1435 = vrot.lane.b32.xlu0 %v6476_v9, %s5877_s21 }
 0x1d7   :  { %1433 = vrot.lane.b32.xlu1 %v6483_v21, %s5877_s21 }
 0x1d8   :  { %1383 = vrot.lane.b32.xlu0 %v6473_v13, %s5878_s22 }
 0x1db   :  { %1437 = vrot.lane.b32.xlu1 %v6490_v38, %s5877_s21 }
 0x1dc   :  { %1387 = vrot.lane.b32.xlu0 %v6476_v9, %s5878_s22 }
 0x1df   :  { %1385 = vrot.lane.b32.xlu1 %v6483_v21, %s5878_s22 }
 0x1e0   :  { %1443 = vrot.lane.b32.xlu0 %v6473_v13, %s5879_s23 }
 0x1e3   :  { %1389 = vrot.lane.b32.xlu1 %v6490_v38, %s5878_s22 }
 0x1e4   :  { %1447 = vrot.lane.b32.xlu0 %v6476_v9, %s5879_s23 }
 0x1e7   :  { %1445 = vrot.lane.b32.xlu1 %v6483_v21, %s5879_s23 }
 0x1e8   :  { %1455 = vrot.lane.b32.xlu0 %v6473_v13, %s5880_s24 }
 0x1eb   :  { %1449 = vrot.lane.b32.xlu1 %v6490_v38, %s5879_s23 }
 0x1ec   :  { %1459 = vrot.lane.b32.xlu0 %v6476_v9, %s5880_s24 }
 0x1ef   :  { %1457 = vrot.lane.b32.xlu1 %v6483_v21, %s5880_s24 }
 0x1f0   :  { %1467 = vrot.lane.b32.xlu0 %v6473_v13, %s5881_s25 }
 0x1f3   :  { %1461 = vrot.lane.b32.xlu1 %v6490_v38, %s5880_s24 }
 0x1f4   :  { %1471 = vrot.lane.b32.xlu0 %v6476_v9, %s5881_s25 }
 0x1f7   :  { %1469 = vrot.lane.b32.xlu1 %v6483_v21, %s5881_s25 }
 0x1fb   :  { %1473 = vrot.lane.b32.xlu1 %v6490_v38, %s5881_s25 }
 0x22d   :  { %v1408_v26 = vpop.permute.xlu1 %1407 }
 0x22e   :  { %v1412_v44 = vpop.permute.xlu0 %1411 }
 0x231   :  { %v1410_v56 = vpop.permute.xlu1 %1409 }
 0x232   :  { %v1420_v46 = vpop.permute.xlu0 %1419  ;;  %v6554_v49 = vsel %vm84_vm1, %v1408_v26, %v1410_v56  ;;  %v1416_v18 = vsel %vm84_vm1, %v1410_v56, %v1412_v44 }
 0x233   :  { %v1496_v4 = vrot.slane %v6554_v49, 2  ;;  %v1497_v28 = vrot.slane %v1416_v18, 2 }
 0x235   :  { %v1414_v11 = vpop.permute.xlu1 %1413 }
 0x236   :  { %v1424_v60 = vpop.permute.xlu0 %1423  ;;  %v6558_v29 = vsel %vm84_vm1, %v1414_v11, %v1408_v26  ;;  %v6566_v12 = vsel %vm84_vm1, %v1412_v44, %v1414_v11  ;;  %v1522_v26 = vrot.slane %v6490_v38, 4 }
 0x237   :  { %v1495_v55 = vrot.slane %v6558_v29, 2  ;;  %v1498_v3 = vrot.slane %v6566_v12, 2 }
 0x239   :  { %v1422_v39 = vpop.permute.xlu1 %1421 }
 0x23a   :  { %v1396_v63 = vpop.permute.xlu0 %1395  ;;  %v1429_v58 = vsel %vm97_vm0, %v1420_v46, %v1422_v39  ;;  %v1428_v57 = vsel %vm97_vm0, %v1422_v39, %v1424_v60 }
 0x23b   :  { %v1508_v52 = vrot.slane %v1429_v58, 7  ;;  %v1509_v35 = vrot.slane %v1428_v57, 7 }
 0x23d   :  { %v1426_v33 = vpop.permute.xlu1 %1425  ;;  %v1572_v17 = vsel %vm240_vm2, %v1496_v4, %v1508_v52  ;;  %v1521_v52 = vrot.slane %v6476_v9, 4 }
 0x23e   :  { %v1400_v8 = vpop.permute.xlu0 %1399  ;;  %v1430_v23 = vsel %vm97_vm0, %v1426_v33, %v1420_v46  ;;  %v1427_v41 = vsel %vm97_vm0, %v1424_v60, %v1426_v33  ;;  %v1576_v62 = vsel %vm245_vm5, %v1572_v17, %v1520_v7 }
 0x23f   :  { %v1507_v45 = vrot.slane %v1430_v23, 7  ;;  %v1510_v42 = vrot.slane %v1427_v41, 7  ;;  %v1573_v23 = vsel %vm240_vm2, %v1497_v28, %v1509_v35 }
 0x241   :  { %v1398_v31 = vpop.permute.xlu1 %1397  ;;  %v1571_v54 = vsel %vm240_vm2, %v1495_v55, %v1507_v45  ;;  %v1574_v44 = vsel %vm240_vm2, %v1498_v3, %v1510_v42 }
 0x242   :  { %v1432_v32 = vpop.permute.xlu0 %1431  ;;  %v1575_v21 = vsel %vm245_vm5, %v1571_v54, %v1519_v43  ;;  %v1404_v56 = vsel %vm71_vm6, %v1398_v31, %v1400_v8  ;;  %v1405_v49 = vsel %vm71_vm6, %v1396_v63, %v1398_v31 }
 0x243   :  { %v1485_v45 = vrot.slane %v1404_v56, 5  ;;  %v1484_v18 = vrot.slane %v1405_v49, 5 }
 0x245   :  { %v1402_v61 = vpop.permute.xlu1 %1401 }
 0x246   :  { %v1436_v0 = vpop.permute.xlu0 %1435  ;;  %v1406_v41 = vsel %vm71_vm6, %v1402_v61, %v1396_v63  ;;  %v1577_v63 = vsel %vm245_vm5, %v1573_v23, %v1521_v52 }
 0x247   :  { %v1483_v42 = vrot.slane %v1406_v41, 5 }
 0x249   :  { %v1434_v6 = vpop.permute.xlu1 %1433 }
 0x24a   :  { %v1384_v53 = vpop.permute.xlu0 %1383  ;;  %v6579_v47 = vsel %vm110_vm4, %v1434_v6, %v1436_v0  ;;  %v6583_v20 = vsel %vm110_vm4, %v1432_v32, %v1434_v6 }
 0x24b   :  { %v1531_v10 = vrot.slane %v6583_v20, 1  ;;  %v1532_v14 = vrot.slane %v6579_v47, 1 }
 0x24d   :  { %v1579_v13 = vsel %vm250_vm7, %v1575_v21, %v1531_v10  ;;  %v1580_v46 = vsel %vm250_vm7, %v1576_v62, %v1532_v14  ;;  %v1438_v11 = vpop.permute.xlu1 %1437 }
 0x24e   :  { %v6602_v60 = vmul.f32 %v1579_v13, %v6061_v59  ;;  %v1596_v39 = vmul.f32 %v1580_v46, %v6071_v1  ;;  %v1388_v38 = vpop.permute.xlu0 %1387  ;;  %v6607_v33 = vsel %vm110_vm4, %v1436_v0, %v1438_v11  ;;  %v6611_v58 = vsel %vm110_vm4, %v1438_v11, %v1432_v32 }
 0x24f   :  { %v1534_v59 = vrot.slane %v6611_v58, 1  ;;  %v1403_v1 = vsel %vm71_vm6, %v1400_v8, %v1402_v61  ;;  %v1578_v0 = vsel %vm245_vm5, %v1574_v44, %v1522_v26  ;;  %v1533_v12 = vrot.slane %v6607_v33, 1 }
 0x250   :  { %v1625_v32 = vand.u32 4294901760, %v6602_v60  ;;  %v1623_v57 = vand.u32 4294901760, %v1596_v39  ;;  %v1486_v6 = vrot.slane %v1403_v1, 5 }
 0x251   :  { %v1582_v31 = vsel %vm250_vm7, %v1578_v0, %v1534_v59  ;;  %v1386_v9 = vpop.permute.xlu1 %1385  ;;  %v1581_v21 = vsel %vm250_vm7, %v1577_v63, %v1533_v12 }
 0x252   :  { %v1444_v17 = vpop.permute.xlu0 %1443  ;;  %v1392_v8 = vsel %vm58_vm8, %v1386_v9, %v1388_v38  ;;  %v1393_v61 = vsel %vm58_vm8, %v1384_v53, %v1386_v9  ;;  %v1598_v7 = vmul.f32 %v1582_v31, %v6076_v2  ;;  %v6638_v62 = vsub.f32 %v6602_v60, %v1625_v32 }
 0x253   :  { %v1565_v54 = vsel %vm230_vm9, %v1392_v8, %v1485_v45  ;;  %v1564_v43 = vsel %vm230_vm9, %v1393_v61, %v1484_v18  ;;  %v6644_v56 = vsub.f32 %v1596_v39, %v1623_v57 }
 0x254   :  { %v1569_v35 = vsel %vm235_vm10, %v1565_v54, %v1497_v28  ;;  %v1568_v26 = vsel %vm235_vm10, %v1564_v43, %v1496_v4  ;;  %v2166_v49 = vand.u32 4294901760, %v1598_v7 }
 0x255   :  { %v1390_v44 = vpop.permute.xlu1 %1389  ;;  %v1592_v13 = vmul.f32 %v1568_v26, %v6101_v15  ;;  %v1593_v2 = vmul.f32 %v1569_v35, %v6140_v51  ;;  %v1597_v51 = vmul.f32 %v1581_v21, %v6108_v19 }
 0x256   :  { %v1448_v46 = vpop.permute.xlu0 %1447  ;;  %v1391_v28 = vsel %vm58_vm8, %v1388_v38, %v1390_v44  ;;  %v1394_v11 = vsel %vm58_vm8, %v1390_v44, %v1384_v53  ;;  %v1717_v53 = vand.u32 4294901760, %v6644_v56 }
 0x257   :  { %v1563_v60 = vsel %vm230_vm9, %v1394_v11, %v1483_v42  ;;  %v1566_v23 = vsel %vm230_vm9, %v1391_v28, %v1486_v6  ;;  %v1619_v15 = vand.u32 4294901760, %v1592_v13  ;;  %v2164_v1 = vand.u32 4294901760, %v1593_v2 }
 0x258   :  { %v1567_v4 = vsel %vm235_vm10, %v1563_v60, %v1495_v55  ;;  %v1570_v39 = vsel %vm235_vm10, %v1566_v23, %v1498_v3  ;;  %v1723_v55 = vand.u32 4294901760, %v6638_v62  ;;  %v1718_v63 = vsub.f32 %v6644_v56, %v1717_v53 }
 0x259   :  { %v1591_v52 = vmul.f32 %v1567_v4, %v6127_v34  ;;  %v1594_v38 = vmul.f32 %v1570_v39, %v6132_v40  ;;  %v1446_v45 = vpop.permute.xlu1 %1445  ;;  %v6662_v0 = vpack.c.bf16 %v1623_v57, %v1619_v15  ;;  %v6664_v29 = vsub.f32 %v1592_v13, %v1619_v15 }
 0x25a   :  { %v1456_v41 = vpop.permute.xlu0 %1455  ;;  %v1452_v31 = vsel %vm123_vm11, %v1446_v45, %v1448_v46  ;;  %v1453_v19 = vsel %vm123_vm11, %v1444_v17, %v1446_v45  ;;  %v6672_v40 = vsub.f32 %v1598_v7, %v2166_v49  ;;  %v2168_v57 = vand.u32 4294901760, %v1597_v51 }
 0x25b   :  { %v1621_v3 = vand.u32 4294901760, %v1591_v52  ;;  %v2162_v34 = vand.u32 4294901760, %v1594_v38  ;;  %5460 = vmatprep.subr.bf16.mxu0 %v6662_v0  ;;  %v1705_v9 = vand.u32 4294901760, %v6664_v29  ;;  %v1543_v61 = vrot.slane %v1453_v19, 6 }
 0x25c   :  { %v1544_v54 = vrot.slane %v1452_v31, 6  ;;  %v6686_v7 = vsub.f32 %v1593_v2, %v2164_v1  ;;  %v6689_v21 = vpack.c.bf16 %v2168_v57, %v2164_v1  ;;  %v2260_v2 = vand.u32 4294901760, %v6672_v40 }
 0x25d   :  { %v6675_v18 = vsub.f32 %v1591_v52, %v1621_v3  ;;  %v1450_v8 = vpop.permute.xlu1 %1449  ;;  %v6677_v42 = vpack.c.bf16 %v1625_v32, %v1621_v3  ;;  %v6682_v43 = vpack.c.bf16 %v2166_v49, %v2162_v34  ;;  %v6684_v35 = vsub.f32 %v1594_v38, %v2162_v34 }
 0x25e   :  { %v1460_v6 = vpop.permute.xlu0 %1459  ;;  %v6694_v32 = vsub.f32 %v6638_v62, %v1723_v55  ;;  %v1451_v26 = vsel %vm123_vm11, %v1448_v46, %v1450_v8  ;;  %v1454_v44 = vsel %vm123_vm11, %v1450_v8, %v1444_v17  ;;  %v1706_v13 = vsub.f32 %v6664_v29, %v1705_v9 }
 0x25f   :  { %5462 = vmatpush1.bf16.msra.mxu0 %v6677_v42  ;;  %5508 = vmatprep.subr.bf16.mxu1 %v6682_v43  ;;  %v6705_v28 = vsub.f32 %v1597_v51, %v2168_v57  ;;  %v1719_v60 = vand.u32 4294901760, %v1718_v63  ;;  %v1711_v23 = vand.u32 4294901760, %v6675_v18  ;;  %v2248_v46 = vand.u32 4294901760, %v6684_v35 }
 0x260   :  { %5510 = vmatpush1.bf16.msra.mxu1 %v6689_v21  ;;  %v1583_v17 = vsel %vm255_vm12, %v1531_v10, %v1543_v61  ;;  %v1584_v4 = vsel %vm255_vm12, %v1532_v14, %v1544_v54  ;;  %v1545_v49 = vrot.slane %v1451_v26, 6  ;;  %v1546_v51 = vrot.slane %v1454_v44, 6 }
 0x261   :  { %v1458_v11 = vpop.permute.xlu1 %1457  ;;  %v1707_v1 = vand.u32 4294901760, %v1706_v13  ;;  %v1725_v20 = vand.u32 4294901760, %v6694_v32  ;;  %v2261_v47 = vsub.f32 %v6672_v40, %v2260_v2  ;;  %v2254_v10 = vand.u32 4294901760, %v6686_v7 }
 0x262   :  { %v1464_v39 = vsel %vm136_vm13, %v1458_v11, %v1460_v6  ;;  %v1465_v15 = vsel %vm136_vm13, %v1456_v41, %v1458_v11  ;;  %v1468_v52 = vpop.permute.xlu0 %1467  ;;  %v1712_v19 = vsub.f32 %v6675_v18, %v1711_v23  ;;  %v2249_v34 = vsub.f32 %v6684_v35, %v2248_v46 }
 0x263   :  { %v1555_v38 = vrot.slane %v1465_v15, 3  ;;  %v1556_v45 = vrot.slane %v1464_v39, 3  ;;  %v1585_v54 = vsel %vm255_vm12, %v1533_v12, %v1545_v49  ;;  %v1586_v32 = vsel %vm255_vm12, %v1534_v59, %v1546_v51  ;;  %v7991_v49 = vld [vmem:[#allocation4_spill] sm:$0xff] }
 0x264   :  { %v5467_v11 = vpack.c.bf16 %v1719_v60, %v1707_v1  ;;  %v1713_v39 = vand.u32 4294901760, %v1712_v19  ;;  %v2250_v33 = vand.u32 4294901760, %v2249_v34 }
 0x265   :  { %v1587_v14 = vsel %vm260_vm14, %v1583_v17, %v1555_v38  ;;  %v1588_v3 = vsel %vm260_vm14, %v1584_v4, %v1556_v45  ;;  %v1462_v31 = vpop.permute.xlu1 %1461  ;;  %v6761_v45 = vsub.f32 %v6686_v7, %v2254_v10 }
 0x266   :  { %v1599_v57 = vmul.f32 %v1587_v14, %v6220_v36  ;;  %v1600_v8 = vmul.f32 %v1588_v3, %v6247_v24  ;;  %v1463_v63 = vsel %vm136_vm13, %v1460_v6, %v1462_v31  ;;  %v1466_v61 = vsel %vm136_vm13, %v1462_v31, %v1456_v41  ;;  %v1472_v17 = vpop.permute.xlu0 %1471 }
 0x267   :  { %v1557_v26 = vrot.slane %v1463_v63, 3  ;;  %v1558_v44 = vrot.slane %v1466_v61, 3  ;;  %v2262_v24 = vand.u32 4294901760, %v2261_v47  ;;  %v7992_v47 = vld [vmem:[#allocation2_spill] sm:$0xff]  ;;  %v5469_v19 = vpack.c.bf16 %v1725_v20, %v1713_v39 }
 0x268   :  { %v1629_v13 = vand.u32 4294901760, %v1599_v57  ;;  %v1627_v36 = vand.u32 4294901760, %v1600_v8 }
 0x269   :  { %v1589_v6 = vsel %vm260_vm14, %v1585_v54, %v1557_v26  ;;  %v1590_v4 = vsel %vm260_vm14, %v1586_v32, %v1558_v44  ;;  %v1470_v41 = vpop.permute.xlu1 %1469  ;;  %v5515_v34 = vpack.c.bf16 %v2262_v24, %v2250_v33  ;;  %v7993_v44 = vld [vmem:[#allocation5_spill] sm:$0xff] }
 0x26a   :  { %v6747_v15 = vsub.f32 %v1599_v57, %v1629_v13  ;;  %v1601_v58 = vmul.f32 %v1589_v6, %v6269_v37  ;;  %v1602_v59 = vmul.f32 %v1590_v4, %v6252_v25  ;;  %v1476_v12 = vsel %vm149_vm15, %v1470_v41, %v1472_v17 }
 0x26b   :  { %v1477_v60 = vsel %vm149_vm15, %v1468_v52, %v1470_v41  ;;  %v1604_v51 = vmul.f32 %v1476_v12, %v7991_v49  ;;  %v6756_v38 = vsub.f32 %v1600_v8, %v1627_v36  ;;  %v2266_v25 = vand.u32 4294901760, %v6705_v28  ;;  %v7994_v41 = vld [vmem:[#allocation3_spill] sm:$0xff] }
 0x26c   :  { %v2172_v1 = vand.u32 4294901760, %v1601_v58  ;;  %v1603_v37 = vmul.f32 %v1477_v60, %v7992_v47  ;;  %v2170_v14 = vand.u32 4294901760, %v1602_v59  ;;  %v1735_v57 = vand.u32 4294901760, %v6747_v15 }
 0x26d   :  { %v1611_v3 = vsel %vm230_vm9, %v1604_v51, 0  ;;  %v1474_v31 = vpop.permute.xlu1 %1473  ;;  %v1729_v54 = vand.u32 4294901760, %v6756_v38 }
 0x26e   :  { %v1608_v8 = vsel %vm230_vm9, %v1603_v37, 0  ;;  %v1631_v63 = vand.u32 4294901760, %v1611_v3  ;;  %v1475_v61 = vsel %vm149_vm15, %v1472_v17, %v1474_v31  ;;  %v1478_v26 = vsel %vm149_vm15, %v1474_v31, %v1468_v52 }
 0x26f   :  { %v1633_v32 = vand.u32 4294901760, %v1608_v8  ;;  %v1605_v6 = vmul.f32 %v1475_v61, %v7993_v44  ;;  %v6774_v4 = vsub.f32 %v1602_v59, %v2170_v14  ;;  %v6776_v20 = vsub.f32 %v1601_v58, %v2172_v1 }
 0x270   :  { %v6778_v24 = vsub.f32 %v1611_v3, %v1631_v63  ;;  %v1606_v39 = vmul.f32 %v1478_v26, %v7994_v41  ;;  %v6781_v33 = vpack.c.bf16 %v1631_v63, %v1627_v36  ;;  %v2267_v52 = vsub.f32 %v6705_v28, %v2266_v25 }
 0x271   :  { %v6783_v12 = vsub.f32 %v1608_v8, %v1633_v32  ;;  %v1614_v17 = vsel %vm230_vm9, %v1605_v6, 0  ;;  %v6786_v60 = vpack.c.bf16 %v1633_v32, %v1629_v13  ;;  %v1730_v36 = vsub.f32 %v6756_v38, %v1729_v54 }
 0x272   :  { %v1617_v59 = vsel %vm230_vm9, %v1606_v39, 0  ;;  %v2176_v58 = vand.u32 4294901760, %v1614_v17  ;;  %5464 = vmatprep.subr.bf16.mxu0 %v6781_v33  ;;  %v1741_v49 = vand.u32 4294901760, %v6778_v24  ;;  %v1736_v13 = vsub.f32 %v6747_v15, %v1735_v57 }
 0x273   :  { %v1747_v51 = vand.u32 4294901760, %v6783_v12  ;;  %v2174_v47 = vand.u32 4294901760, %v1617_v59  ;;  %5466 = vmatpush1.bf16.msra.mxu0 %v6786_v60  ;;  %v2272_v37 = vand.u32 4294901760, %v6774_v4  ;;  %v2278_v63 = vand.u32 4294901760, %v6776_v20 }
 0x274   :  { %v6803_v3 = vsub.f32 %v1614_v17, %v2176_v58  ;;  %5468 = vmatprep.subr.bf16.mxu0 %v5467_v11  ;;  %v6805_v31 = vpack.c.bf16 %v2176_v58, %v2172_v1  ;;  %v1742_v8 = vsub.f32 %v6778_v24, %v1741_v49  ;;  %v2256_v44 = vand.u32 4294901760, %v6761_v45 }
 0x275   :  { %v6811_v61 = vsub.f32 %v1617_v59, %v2174_v47  ;;  %v6813_v32 = vpack.c.bf16 %v2174_v47, %v2170_v14  ;;  %v1748_v26 = vsub.f32 %v6783_v12, %v1747_v51  ;;  %v1731_v1 = vand.u32 4294901760, %v1730_v36 }
 0x276   :  { %v2290_v11 = vand.u32 4294901760, %v6803_v3  ;;  %1697 = vmatmul.mubr.f32.vlgmr.msra.gmra.mrb[2].mxu0 %v6205_v50  ;;  %v1743_v6 = vand.u32 4294901760, %v1742_v8  ;;  %v2279_v41 = vsub.f32 %v6776_v20, %v2278_v63  ;;  %v1737_v14 = vand.u32 4294901760, %v1736_v13 }
 0x277   :  { %5512 = vmatprep.subr.bf16.mxu1 %v6813_v32  ;;  %5470 = vmatpush1.bf16.msra.mxu0 %v5469_v19  ;;  %v1749_v39 = vand.u32 4294901760, %v1748_v26  ;;  %v2273_v17 = vsub.f32 %v6774_v4, %v2272_v37  ;;  %v2284_v45 = vand.u32 4294901760, %v6811_v61  ;;  %v2268_v58 = vand.u32 4294901760, %v2267_v52 }
 0x278   :  { %5514 = vmatpush1.bf16.msra.mxu1 %v6805_v31  ;;  %v5471_v59 = vpack.c.bf16 %v1743_v6, %v1731_v1  ;;  %1807 = vmatprep.mubr.f32.mxu0 %v7974_v27  ;;  %v2291_v36 = vsub.f32 %v6803_v3, %v2290_v11  ;;  %v5475_v8 = vpack.c.bf16 %v6644_v56, %v6664_v29  ;;  %v2280_v26 = vand.u32 4294901760, %v2279_v41 }
 0x279   :  { %5516 = vmatprep.subr.bf16.mxu1 %v5515_v34  ;;  %v5473_v19 = vpack.c.bf16 %v1749_v39, %v1737_v14  ;;  %v2285_v47 = vsub.f32 %v6811_v61, %v2284_v45  ;;  %v5517_v13 = vpack.c.bf16 %v2268_v58, %v2256_v44  ;;  %v2274_v52 = vand.u32 4294901760, %v2273_v17 }
 0x27a   :  { %5472 = vmatprep.subr.bf16.mxu0 %v5471_v59  ;;  %v2292_v1 = vand.u32 4294901760, %v2291_v36  ;;  %v5477_v39 = vpack.c.bf16 %v6638_v62, %v6675_v18  ;;  %v5479_v44 = vpack.c.bf16 %v6778_v24, %v6756_v38  ;;  %v5523_v41 = vpack.c.bf16 %v6672_v40, %v6684_v35 }
 0x27b   :  { %2240 = vmatmul.mubr.f32.vlgmr.msra.gmra.mrb[2].mxu1 %v6205_v50  ;;  %5474 = vmatpush1.bf16.msra.mxu0 %v5473_v19  ;;  %v2286_v6 = vand.u32 4294901760, %v2285_v47  ;;  %v5481_v17 = vpack.c.bf16 %v6783_v12, %v6747_v15  ;;  %v5525_v59 = vpack.c.bf16 %v6705_v28, %v6686_v7  ;;  %v5527_v58 = vpack.c.bf16 %v6811_v61, %v6774_v4 }
 0x27c   :  { %5518 = vmatpush1.bf16.msra.mxu1 %v5517_v13  ;;  %5476 = vmatprep.subr.bf16.mxu0 %v5475_v8  ;;  %v5521_v34 = vpack.c.bf16 %v2292_v1, %v2280_v26  ;;  %v5529_v36 = vpack.c.bf16 %v6803_v3, %v6776_v20  ;;  %v5491_v19 = vpack.c.bf16 %v1717_v53, %v1705_v9 }
 0x27d   :  { %v5519_v14 = vpack.c.bf16 %v2286_v6, %v2274_v52  ;;  %2350 = vmatprep.mubr.f32.mxu1 %v7974_v27  ;;  %v5493_v47 = vpack.c.bf16 %v1723_v55, %v1711_v23  ;;  %v5495_v56 = vpack.c.bf16 %v1741_v49, %v1729_v54  ;;  %v5539_v53 = vpack.c.bf16 %v2260_v2, %v2248_v46 }
 0x27e   :  { %1809 = vmatmul.mubr.f32.vlgmr.msra.gmra.mrb[2].mxu0 %v6032_v48  ;;  %v5497_v62 = vpack.c.bf16 %v1747_v51, %v1735_v57  ;;  %v5541_v29 = vpack.c.bf16 %v2266_v25, %v2254_v10  ;;  %v5543_v55 = vpack.c.bf16 %v2284_v45, %v2272_v37  ;;  %v5545_v40 = vpack.c.bf16 %v2290_v11, %v2278_v63 }
 0x27f   :  { %5520 = vmatprep.subr.bf16.mxu1 %v5519_v14  ;;  %5478 = vmatpush1.bf16.msra.mxu0 %v5477_v39 }
 0x280   :  { %5522 = vmatpush1.bf16.msra.mxu1 %v5521_v34  ;;  %5480 = vmatprep.subr.bf16.mxu0 %v5479_v44 }
 0x281   :  { %5524 = vmatprep.subr.bf16.mxu1 %v5523_v41  ;;  %1895 = vmatprep.mubr.f32.mxu0 %v7974_v27 }
 0x283   :  { %2352 = vmatmul.mubr.f32.vlgmr.msra.gmra.mrb[2].mxu1 %v6032_v48  ;;  %5482 = vmatpush1.bf16.msra.mxu0 %v5481_v17 }
 0x284   :  { %5526 = vmatpush1.bf16.msra.mxu1 %v5525_v59  ;;  %5484 = vmatprep.subr.bf16.mxu0 %v6662_v0 }
 0x285   :  { %5528 = vmatprep.subr.bf16.mxu1 %v5527_v58  ;;  %2438 = vmatprep.mubr.f32.mxu1 %v7974_v27 }
 0x286   :  { %1898 = vmatmul.mubr.f32.vlgmr.msra.gmra.mrb[2].mxu0 %v6113_v22 }
 0x287   :  { %5486 = vmatpush1.bf16.msra.mxu0 %v6677_v42  ;;  %1976 = vmatprep.mubr.f32.mxu0 %v7974_v27 }
 0x288   :  { %5530 = vmatpush1.bf16.msra.mxu1 %v5529_v36  ;;  %5488 = vmatprep.subr.bf16.mxu0 %v6781_v33 }
 0x289   :  { %5532 = vmatprep.subr.bf16.mxu1 %v6682_v43 }
 0x28b   :  { %2441 = vmatmul.mubr.f32.vlgmr.msra.gmra.mrb[2].mxu1 %v6113_v22  ;;  %5490 = vmatpush1.bf16.msra.mxu0 %v6786_v60 }
 0x28c   :  { %5534 = vmatpush1.bf16.msra.mxu1 %v6689_v21  ;;  %5492 = vmatprep.subr.bf16.mxu0 %v5491_v19 }
 0x28d   :  { %5536 = vmatprep.subr.bf16.mxu1 %v6813_v32  ;;  %2519 = vmatprep.mubr.f32.mxu1 %v7974_v27 }
 0x28e   :  { %1980 = vmatmul.mubr.f32.vlgmr.msra.gmra.mrb[2].mxu0 %v6163_v30 }
 0x28f   :  { %5494 = vmatpush1.bf16.msra.mxu0 %v5493_v47  ;;  %2074 = vmatprep.mubr.f32.mxu0 %v7974_v27 }
 0x290   :  { %5538 = vmatpush1.bf16.msra.mxu1 %v6805_v31  ;;  %5496 = vmatprep.subr.bf16.mxu0 %v5495_v56 }
 0x291   :  { %5540 = vmatprep.subr.bf16.mxu1 %v5539_v53 }
 0x293   :  { %2523 = vmatmul.mubr.f32.vlgmr.msra.gmra.mrb[2].mxu1 %v6163_v30  ;;  %5498 = vmatpush1.bf16.msra.mxu0 %v5497_v62 }
 0x294   :  { %5542 = vmatpush1.bf16.msra.mxu1 %v5541_v29  ;;  %5500 = vmatprep.subr.bf16.mxu0 %v6662_v0 }
 0x295   :  { %5544 = vmatprep.subr.bf16.mxu1 %v5543_v55  ;;  %2617 = vmatprep.mubr.f32.mxu1 %v7974_v27 }
 0x296   :  { %2076 = vmatmul.mubr.f32.vlgmr.msra.gmra.mrb[2].mxu0 %v6032_v48 }
 0x297   :  { %5502 = vmatpush1.bf16.msra.mxu0 %v6677_v42  ;;  %2154 = vmatprep.mubr.f32.mxu0 %v7974_v27 }
 0x298   :  { %5546 = vmatpush1.bf16.msra.mxu1 %v5545_v40  ;;  %5504 = vmatprep.subr.bf16.mxu0 %v6781_v33 }
 0x299   :  { %5548 = vmatprep.subr.bf16.mxu1 %v6682_v43 }
 0x29b   :  { %2619 = vmatmul.mubr.f32.vlgmr.msra.gmra.mrb[2].mxu1 %v6032_v48  ;;  %5506 = vmatpush1.bf16.msra.mxu0 %v6786_v60 }
 0x29c   :  { %5550 = vmatpush1.bf16.msra.mxu1 %v6689_v21  ;;  %2697 = vmatprep.mubr.f32.mxu1 %v7974_v27 }
 0x29d   :  { %5552 = vmatprep.subr.bf16.mxu1 %v6813_v32 }
 0x29e   :  { %2156 = vmatmul.mubr.f32.vlgmr.msra.gmra.mrb[2].mxu0 %v6032_v48 }
 0x29f   :  { %3013 = vmatprep.mubr.f32.mxu0 %v7974_v27 }
 0x2a0   :  { %5554 = vmatpush1.bf16.msra.mxu1 %v6805_v31 }
 0x2a3   :  { %2699 = vmatmul.mubr.f32.vlgmr.msra.gmra.mrb[2].mxu1 %v6032_v48 }
 0x2a4   :  { %3556 = vmatprep.mubr.f32.mxu1 %v7974_v27 }
 0x371   :  { %v2157_v0 = vpop.f32.mrb[2].mxu0 }
 0x372   :  { %v6924_v9 = vadd.f32 %v2157_v0, %v6470_v5  ;;  %v2159_v18 = vpop.f32.mrb[3].mxu0 }
 0x373   :  { %v6927_v42 = vadd.f32 %v2159_v18, %v6470_v5 }
 0x374   :  { %2729 = vrot.lane.b32.xlu0 %v6924_v9, %s5874_s19  ;;  %v2841_v34 = vrot.slane %v6924_v9, 4 }
 0x375   :  { %2731 = vrot.lane.b32.xlu1 %v6927_v42, %s5874_s19  ;;  %v2842_v14 = vrot.slane %v6927_v42, 4 }
 0x376   :  { %v2700_v43 = vpop.f32.mrb[2].mxu1 }
 0x377   :  { %v6934_v35 = vadd.f32 %v2700_v43, %v6470_v5  ;;  %v2702_v7 = vpop.f32.mrb[3].mxu1 }
 0x378   :  { %v6937_v21 = vadd.f32 %v2702_v7, %v6470_v5 }
 0x379   :  { %2733 = vrot.lane.b32.xlu0 %v6934_v35, %s5874_s19  ;;  %v2843_v17 = vrot.slane %v6934_v35, 4 }
 0x37a   :  { %2735 = vrot.lane.b32.xlu1 %v6937_v21, %s5874_s19  ;;  %v2844_v59 = vrot.slane %v6937_v21, 4 }
 0x37d   :  { %2741 = vrot.lane.b32.xlu0 %v6924_v9, %s5875_s20 }
 0x37e   :  { %2743 = vrot.lane.b32.xlu1 %v6927_v42, %s5875_s20 }
 0x381   :  { %2745 = vrot.lane.b32.xlu0 %v6934_v35, %s5875_s20 }
 0x382   :  { %2747 = vrot.lane.b32.xlu1 %v6937_v21, %s5875_s20 }
 0x385   :  { %2717 = vrot.lane.b32.xlu0 %v6924_v9, %s5876_s3 }
 0x386   :  { %2719 = vrot.lane.b32.xlu1 %v6927_v42, %s5876_s3 }
 0x389   :  { %2721 = vrot.lane.b32.xlu0 %v6934_v35, %s5876_s3 }
 0x38a   :  { %2723 = vrot.lane.b32.xlu1 %v6937_v21, %s5876_s3 }
 0x38d   :  { %2753 = vrot.lane.b32.xlu0 %v6924_v9, %s5877_s21 }
 0x38e   :  { %2755 = vrot.lane.b32.xlu1 %v6927_v42, %s5877_s21 }
 0x391   :  { %2757 = vrot.lane.b32.xlu0 %v6934_v35, %s5877_s21 }
 0x392   :  { %2759 = vrot.lane.b32.xlu1 %v6937_v21, %s5877_s21 }
 0x395   :  { %2705 = vrot.lane.b32.xlu0 %v6924_v9, %s5878_s22 }
 0x396   :  { %2707 = vrot.lane.b32.xlu1 %v6927_v42, %s5878_s22 }
 0x399   :  { %2709 = vrot.lane.b32.xlu0 %v6934_v35, %s5878_s22 }
 0x39a   :  { %2711 = vrot.lane.b32.xlu1 %v6937_v21, %s5878_s22 }
 0x39d   :  { %2765 = vrot.lane.b32.xlu0 %v6924_v9, %s5879_s23 }
 0x39e   :  { %2767 = vrot.lane.b32.xlu1 %v6927_v42, %s5879_s23 }
 0x3a1   :  { %2769 = vrot.lane.b32.xlu0 %v6934_v35, %s5879_s23 }
 0x3a2   :  { %2771 = vrot.lane.b32.xlu1 %v6937_v21, %s5879_s23 }
 0x3a5   :  { %2777 = vrot.lane.b32.xlu0 %v6924_v9, %s5880_s24 }
 0x3a6   :  { %2779 = vrot.lane.b32.xlu1 %v6927_v42, %s5880_s24 }
 0x3a9   :  { %2781 = vrot.lane.b32.xlu0 %v6934_v35, %s5880_s24 }
 0x3aa   :  { %2783 = vrot.lane.b32.xlu1 %v6937_v21, %s5880_s24 }
 0x3ad   :  { %2789 = vrot.lane.b32.xlu0 %v6924_v9, %s5881_s25 }
 0x3ae   :  { %2791 = vrot.lane.b32.xlu1 %v6927_v42, %s5881_s25 }
 0x3b1   :  { %2793 = vrot.lane.b32.xlu0 %v6934_v35, %s5881_s25 }
 0x3b2   :  { %2795 = vrot.lane.b32.xlu1 %v6937_v21, %s5881_s25 }
 0x3e6   :  { %v2730_v2 = vpop.permute.xlu0 %2729 }
 0x3e7   :  { %v2732_v28 = vpop.permute.xlu1 %2731 }
 0x3e8   :  { %v7003_v24 = vsel %vm84_vm1, %v2730_v2, %v2732_v28 }
 0x3e9   :  { %v2818_v31 = vrot.slane %v7003_v24, 2 }
 0x3eb   :  { %v2734_v23 = vpop.permute.xlu0 %2733 }
 0x3ec   :  { %v2736_v46 = vpop.permute.xlu1 %2735  ;;  %v7013_v37 = vsel %vm84_vm1, %v2732_v28, %v2734_v23 }
 0x3ed   :  { %v7017_v3 = vsel %vm84_vm1, %v2736_v46, %v2730_v2  ;;  %v7022_v63 = vsel %vm84_vm1, %v2734_v23, %v2736_v46  ;;  %v2819_v8 = vrot.slane %v7013_v37, 2  ;;  %v7077_v23 = vld [vmem:[%s7924_s2 + $0x28] sm:$0xff] }
 0x3ee   :  { %v2817_v26 = vrot.slane %v7017_v3, 2  ;;  %v2820_v52 = vrot.slane %v7022_v63, 2  ;;  %v7152_v3 = vld [vmem:[%s7924_s2 + $0x18] sm:$0xff] }
 0x3ef   :  { %v2742_v10 = vpop.permute.xlu0 %2741 }
 0x3f0   :  { %v2744_v15 = vpop.permute.xlu1 %2743 }
 0x3f1   :  { %v2751_v4 = vsel %vm97_vm0, %v2742_v10, %v2744_v15 }
 0x3f2   :  { %v2830_v49 = vrot.slane %v2751_v4, 7 }
 0x3f3   :  { %v2746_v38 = vpop.permute.xlu0 %2745 }
 0x3f4   :  { %v2748_v25 = vpop.permute.xlu1 %2747  ;;  %v2750_v33 = vsel %vm97_vm0, %v2744_v15, %v2746_v38  ;;  %v2894_v1 = vsel %vm240_vm2, %v2818_v31, %v2830_v49 }
 0x3f5   :  { %v2752_v12 = vsel %vm97_vm0, %v2748_v25, %v2742_v10  ;;  %v2749_v51 = vsel %vm97_vm0, %v2746_v38, %v2748_v25  ;;  %v2831_v61 = vrot.slane %v2750_v33, 7  ;;  %v2898_v19 = vsel %vm245_vm5, %v2894_v1, %v2842_v14 }
 0x3f6   :  { %v2829_v32 = vrot.slane %v2752_v12, 7  ;;  %v2832_v45 = vrot.slane %v2749_v51, 7 }
 0x3f7   :  { %v2718_v57 = vpop.permute.xlu0 %2717  ;;  %v2895_v39 = vsel %vm240_vm2, %v2819_v8, %v2831_v61  ;;  %v7102_v61 = vld [vmem:[%s7924_s2 + $0x20] sm:$0xff] }
 0x3f8   :  { %v2720_v54 = vpop.permute.xlu1 %2719  ;;  %v2893_v44 = vsel %vm240_vm2, %v2817_v26, %v2829_v32  ;;  %v2896_v58 = vsel %vm240_vm2, %v2820_v52, %v2832_v45  ;;  %v2899_v18 = vsel %vm245_vm5, %v2895_v39, %v2843_v17 }
 0x3f9   :  { %v2727_v36 = vsel %vm71_vm6, %v2718_v57, %v2720_v54  ;;  %v2897_v40 = vsel %vm245_vm5, %v2893_v44, %v2841_v34  ;;  %v2900_v7 = vsel %vm245_vm5, %v2896_v58, %v2844_v59 }
 0x3fa   :  { %v2806_v42 = vrot.slane %v2727_v36, 5 }
 0x3fb   :  { %v2722_v20 = vpop.permute.xlu0 %2721 }
 0x3fc   :  { %v2724_v60 = vpop.permute.xlu1 %2723  ;;  %v2726_v43 = vsel %vm71_vm6, %v2720_v54, %v2722_v20 }
 0x3fd   :  { %v2725_v2 = vsel %vm71_vm6, %v2722_v20, %v2724_v60  ;;  %v2728_v28 = vsel %vm71_vm6, %v2724_v60, %v2718_v57  ;;  %v7092_v57 = vld [vmem:[%s7924_s2 + $0x38] sm:$0xff]  ;;  %v2807_v20 = vrot.slane %v2726_v43, 5  ;;  %v7146_v43 = vld [vmem:[%s7924_s2] sm:$0xff] }
 0x3fe   :  { %v2805_v12 = vrot.slane %v2728_v28, 5  ;;  %v2808_v60 = vrot.slane %v2725_v2, 5 }
 0x3ff   :  { %v2754_v11 = vpop.permute.xlu0 %2753 }
 0x400   :  { %v2756_v13 = vpop.permute.xlu1 %2755 }
 0x401   :  { %v7030_v6 = vsel %vm110_vm4, %v2754_v11, %v2756_v13 }
 0x402   :  { %v2853_v53 = vrot.slane %v7030_v6, 1 }
 0x403   :  { %v2758_v41 = vpop.permute.xlu0 %2757 }
 0x404   :  { %v7048_v47 = vsel %vm110_vm4, %v2756_v13, %v2758_v41  ;;  %v2760_v56 = vpop.permute.xlu1 %2759  ;;  %v2901_v38 = vsel %vm250_vm7, %v2897_v40, %v2853_v53 }
 0x405   :  { %v2854_v62 = vrot.slane %v7048_v47, 1  ;;  %v7054_v29 = vsel %vm110_vm4, %v2758_v41, %v2760_v56  ;;  %v7058_v55 = vsel %vm110_vm4, %v2760_v56, %v2754_v11  ;;  %v2917_v32 = vmul.f32 %v7102_v61, %v2901_v38  ;;  %v7108_v11 = vld [vmem:[%s7924_s2 + $0x30] sm:$0xff]  ;;  %v7222_v47 = vld [vmem:[%s7924_s2 + $0x40] sm:$0xff] }
 0x406   :  { %v2855_v0 = vrot.slane %v7054_v29, 1  ;;  %v2856_v9 = vrot.slane %v7058_v55, 1 }
 0x407   :  { %v2902_v35 = vsel %vm250_vm7, %v2898_v19, %v2854_v62  ;;  %v2706_v21 = vpop.permute.xlu0 %2705  ;;  %v7132_v19 = vld [vmem:[%s7924_s2 + $0x10] sm:$0xff] }
 0x408   :  { %v2918_v46 = vmul.f32 %v7077_v23, %v2902_v35  ;;  %v2904_v10 = vsel %vm250_vm7, %v2900_v7, %v2856_v9  ;;  %v2708_v15 = vpop.permute.xlu1 %2707  ;;  %v2903_v25 = vsel %vm250_vm7, %v2899_v18, %v2855_v0 }
 0x409   :  { %v2920_v54 = vmul.f32 %v7092_v57, %v2904_v10  ;;  %v2715_v4 = vsel %vm58_vm8, %v2706_v21, %v2708_v15  ;;  %v2919_v45 = vmul.f32 %v7108_v11, %v2903_v25 }
 0x40a   :  { %v2886_v24 = vsel %vm230_vm9, %v2715_v4, %v2806_v42  ;;  %v2945_v33 = vand.u32 4294901760, %v2918_v46 }
 0x40b   :  { %v2890_v49 = vsel %vm235_vm10, %v2886_v24, %v2818_v31  ;;  %v2710_v51 = vpop.permute.xlu0 %2709  ;;  %v3488_v37 = vand.u32 4294901760, %v2920_v54  ;;  %v7114_v31 = vld [vmem:[%s7924_s2 + $0x8] sm:$0xff] }
 0x40c   :  { %v2914_v13 = vmul.f32 %v7114_v31, %v2890_v49  ;;  %v2714_v1 = vsel %vm58_vm8, %v2708_v15, %v2710_v51  ;;  %v2712_v34 = vpop.permute.xlu1 %2711  ;;  %v7124_v41 = vsub.f32 %v2918_v46, %v2945_v33 }
 0x40d   :  { %v2887_v14 = vsel %vm230_vm9, %v2714_v1, %v2807_v20  ;;  %v2713_v39 = vsel %vm58_vm8, %v2710_v51, %v2712_v34  ;;  %v2716_v44 = vsel %vm58_vm8, %v2712_v34, %v2706_v21  ;;  %v7141_v42 = vsub.f32 %v2920_v54, %v3488_v37 }
 0x40e   :  { %v2891_v17 = vsel %vm235_vm10, %v2887_v14, %v2819_v8  ;;  %v2885_v59 = vsel %vm230_vm9, %v2716_v44, %v2805_v12  ;;  %v2888_v58 = vsel %vm230_vm9, %v2713_v39, %v2808_v60  ;;  %v2941_v36 = vand.u32 4294901760, %v2914_v13 }
 0x40f   :  { %v2915_v56 = vmul.f32 %v7132_v19, %v2891_v17  ;;  %v2889_v40 = vsel %vm235_vm10, %v2885_v59, %v2817_v26  ;;  %v2892_v8 = vsel %vm235_vm10, %v2888_v58, %v2820_v52  ;;  %v2766_v18 = vpop.permute.xlu0 %2765  ;;  %v2947_v21 = vand.u32 4294901760, %v2917_v32 }
 0x410   :  { %v2913_v35 = vmul.f32 %v7146_v43, %v2889_v40  ;;  %v2916_v26 = vmul.f32 %v7152_v3, %v2892_v8  ;;  %v2768_v63 = vpop.permute.xlu1 %2767  ;;  %v7155_v7 = vpack.c.bf16 %v2945_v33, %v2941_v36  ;;  %v7157_v52 = vsub.f32 %v2914_v13, %v2941_v36 }
 0x411   :  { %v3486_v2 = vand.u32 4294901760, %v2915_v56  ;;  %v7949_v10 = vand.u32 4294901760, %v7124_v41  ;;  %v2775_v15 = vsel %vm123_vm11, %v2766_v18, %v2768_v63  ;;  %v7947_v25 = vand.u32 4294901760, %v7141_v42 }
 0x412   :  { %v2943_v28 = vand.u32 4294901760, %v2913_v35  ;;  %5556 = vmatprep.subr.bf16.mxu0 %v7155_v7  ;;  %v3484_v46 = vand.u32 4294901760, %v2916_v26  ;;  %v3490_v54 = vand.u32 4294901760, %v2919_v45  ;;  %v7950_v33 = vand.u32 4294901760, %v7157_v52 }
 0x413   :  { %v2770_v38 = vpop.permute.xlu0 %2769  ;;  %v7169_v12 = vsub.f32 %v2917_v32, %v2947_v21  ;;  %v2865_v13 = vrot.slane %v2775_v15, 6  ;;  %v3040_v34 = vsub.f32 %v7124_v41, %v7949_v10  ;;  %v7191_v44 = vsub.f32 %v7141_v42, %v7947_v25 }
 0x414   :  { %v2774_v4 = vsel %vm123_vm11, %v2768_v63, %v2770_v38  ;;  %v2772_v20 = vpop.permute.xlu1 %2771  ;;  %v7166_v24 = vpack.c.bf16 %v2947_v21, %v2943_v28  ;;  %v7173_v49 = vpack.c.bf16 %v3488_v37, %v3484_v46  ;;  %v7175_v51 = vsub.f32 %v2913_v35, %v2943_v28 }
 0x415   :  { %v2773_v60 = vsel %vm123_vm11, %v2770_v38, %v2772_v20  ;;  %v7178_v1 = vpack.c.bf16 %v3490_v54, %v3486_v2  ;;  %v2866_v14 = vrot.slane %v2774_v4, 6  ;;  %v2776_v32 = vsel %vm123_vm11, %v2772_v20, %v2766_v18 }
 0x416   :  { %5558 = vmatpush1.bf16.msra.mxu0 %v7166_v24  ;;  %5604 = vmatprep.subr.bf16.mxu1 %v7173_v49  ;;  %v7186_v39 = vsub.f32 %v2916_v26, %v3484_v46  ;;  %v2867_v17 = vrot.slane %v2773_v60, 6  ;;  %v3028_v58 = vsub.f32 %v7157_v52, %v7950_v33  ;;  %v7197_v36 = vsub.f32 %v2919_v45, %v3490_v54 }
 0x417   :  { %v2778_v37 = vpop.permute.xlu0 %2777  ;;  %5606 = vmatpush1.bf16.msra.mxu1 %v7178_v1  ;;  %v7199_v40 = vsub.f32 %v2915_v56, %v3486_v2  ;;  %v7944_v18 = vand.u32 4294901760, %v7169_v12  ;;  %v2905_v35 = vsel %vm255_vm12, %v2853_v53, %v2865_v13  ;;  %v2868_v26 = vrot.slane %v2776_v32, 6 }
 0x418   :  { %v2780_v59 = vpop.permute.xlu1 %2779  ;;  %v7946_v21 = vand.u32 4294901760, %v7175_v51  ;;  %v2906_v45 = vsel %vm255_vm12, %v2854_v62, %v2866_v14  ;;  %v3041_v56 = vand.u32 4294901760, %v3040_v34  ;;  %v7948_v2 = vand.u32 4294901760, %v7186_v39 }
 0x419   :  { %v2787_v8 = vsel %vm136_vm13, %v2778_v37, %v2780_v59  ;;  %v3584_v46 = vand.u32 4294901760, %v7191_v44  ;;  %v2907_v6 = vsel %vm255_vm12, %v2855_v0, %v2867_v17  ;;  %v3029_v54 = vand.u32 4294901760, %v3028_v58  ;;  %v7253_v17 = vld [vmem:[%s7924_s2 + $0x48] sm:$0xff] }
 0x41a   :  { %v2877_v63 = vrot.slane %v2787_v8, 3  ;;  %v2908_v20 = vsel %vm255_vm12, %v2856_v9, %v2868_v26  ;;  %v7237_v34 = vsub.f32 %v7175_v51, %v7946_v21  ;;  %v3571_v44 = vsub.f32 %v7186_v39, %v7948_v2  ;;  %v7261_v26 = vld [vmem:[%s7924_s2 + $0x50] sm:$0xff] }
 0x41b   :  { %v2782_v28 = vpop.permute.xlu0 %2781  ;;  %v7246_v55 = vsub.f32 %v7169_v12, %v7944_v18  ;;  %v7945_v9 = vand.u32 4294901760, %v7199_v40 }
 0x41c   :  { %v2909_v53 = vsel %vm260_vm14, %v2905_v35, %v2877_v63  ;;  %v2786_v15 = vsel %vm136_vm13, %v2780_v59, %v2782_v28  ;;  %v2784_v38 = vpop.permute.xlu1 %2783 }
 0x41d   :  { %v7225_v62 = vmul.f32 %v7222_v47, %v2909_v53  ;;  %v2878_v4 = vrot.slane %v2786_v15, 3  ;;  %v2785_v29 = vsel %vm136_vm13, %v2782_v28, %v2784_v38  ;;  %v2788_v0 = vsel %vm136_vm13, %v2784_v38, %v2778_v37  ;;  %v7275_v15 = vld [vmem:[%s7924_s2 + $0x60] sm:$0x7] }
 0x41e   :  { %v2879_v60 = vrot.slane %v2785_v29, 3  ;;  %v2880_v13 = vrot.slane %v2788_v0, 3  ;;  %v5563_v53 = vpack.c.bf16 %v3041_v56, %v3029_v54  ;;  %7996 = vst [vmem:[#allocation2_spill] sm:$0xff] %v7275_v15  ;;  %v3035_v29 = vand.u32 4294901760, %v7237_v34 }
 0x41f   :  { %v2910_v14 = vsel %vm260_vm14, %v2906_v45, %v2878_v4  ;;  %v2790_v32 = vpop.permute.xlu0 %2789  ;;  %v2951_v37 = vand.u32 4294901760, %v7225_v62  ;;  %v7267_v45 = vld [vmem:[%s7924_s2 + $0x58] sm:$0xff]  ;;  %v7951_v0 = vand.u32 4294901760, %v7197_v36  ;;  %v7284_v56 = vsub.f32 %v7199_v40, %v7945_v9 }
 0x420   :  { %v2922_v59 = vmul.f32 %v7253_v17, %v2910_v14  ;;  %v2911_v58 = vsel %vm260_vm14, %v2907_v6, %v2879_v60  ;;  %v2912_v8 = vsel %vm260_vm14, %v2908_v20, %v2880_v13  ;;  %v2792_v35 = vpop.permute.xlu1 %2791  ;;  %7995 = vst [vmem:[#allocation4_spill] sm:$0xff] %v7267_v45  ;;  %v3572_v13 = vand.u32 4294901760, %v3571_v44 }
 0x421   :  { %v2923_v63 = vmul.f32 %v7261_v26, %v2911_v58  ;;  %v2924_v28 = vmul.f32 %v7267_v45, %v2912_v8  ;;  %v2799_v6 = vsel %vm149_vm15, %v2790_v32, %v2792_v35  ;;  %v3047_v14 = vand.u32 4294901760, %v7246_v55  ;;  %v7297_v55 = vld [vmem:[%s7924_s2 + $0x68] sm:$0x7] }
 0x422   :  { %v2925_v38 = vmul.f32 %v7275_v15, %v2799_v6  ;;  %v2949_v4 = vand.u32 4294901760, %v2922_v59  ;;  %v7287_v54 = vsub.f32 %v7225_v62, %v2951_v37  ;;  %7997 = vst [vmem:[#allocation5_spill] sm:$0xff] %v7297_v55  ;;  %v3589_v25 = vsub.f32 %v7197_v36, %v7951_v0 }
 0x423   :  { %v2794_v20 = vpop.permute.xlu0 %2793  ;;  %v3492_v60 = vand.u32 4294901760, %v2924_v28  ;;  %v3494_v18 = vand.u32 4294901760, %v2923_v63  ;;  %v5611_v2 = vpack.c.bf16 %v3584_v46, %v3572_v13 }
 0x424   :  { %v2930_v58 = vsel %vm230_vm9, %v2925_v38, 0  ;;  %v2798_v34 = vsel %vm149_vm15, %v2792_v35, %v2794_v20  ;;  %v2796_v8 = vpop.permute.xlu1 %2795  ;;  %v7292_v6 = vsub.f32 %v2922_v59, %v2949_v4  ;;  %v7307_v59 = vld [vmem:[%s7924_s2 + $0x70] sm:$0x7] }
 0x425   :  { %v2955_v44 = vand.u32 4294901760, %v2930_v58  ;;  %v2926_v9 = vmul.f32 %v7297_v55, %v2798_v34  ;;  %v2797_v62 = vsel %vm149_vm15, %v2794_v20, %v2796_v8  ;;  %v2800_v38 = vsel %vm149_vm15, %v2796_v8, %v2790_v32  ;;  %7998 = vst [vmem:[#allocation3_spill] sm:$0xff] %v7307_v59  ;;  %v7321_v32 = vld [vmem:[%s7924_s2 + $0x78] sm:$0x7] }
 0x426   :  { %v2927_v35 = vmul.f32 %v7307_v59, %v2797_v62  ;;  %v7310_v21 = vsub.f32 %v2924_v28, %v3492_v60  ;;  %7999 = vst [vmem:[#allocation6_spill] sm:$0xff] %v7321_v32  ;;  %v2928_v8 = vmul.f32 %v7321_v32, %v2800_v38  ;;  %v7959_v62 = vand.u32 4294901760, %v7292_v6 }
 0x427   :  { %v7315_v34 = vsub.f32 %v2930_v58, %v2955_v44  ;;  %v2933_v20 = vsel %vm230_vm9, %v2926_v9, 0  ;;  %v7327_v0 = vsub.f32 %v2923_v63, %v3494_v18  ;;  %v7338_v38 = vpack.c.bf16 %v2955_v44, %v2951_v37 }
 0x428   :  { %v2953_v10 = vand.u32 4294901760, %v2933_v20  ;;  %v2936_v28 = vsel %vm230_vm9, %v2927_v35, 0  ;;  %v2939_v9 = vsel %vm230_vm9, %v2928_v8, 0  ;;  %v7957_v46 = vand.u32 4294901760, %v7310_v21 }
 0x429   :  { %v7956_v58 = vand.u32 4294901760, %v7315_v34  ;;  %v3498_v59 = vand.u32 4294901760, %v2936_v28  ;;  %v3496_v15 = vand.u32 4294901760, %v2939_v9  ;;  %v8000_v44 = vand.u32 4294901760, %v7287_v54 }
 0x42a   :  { %v7331_v55 = vsub.f32 %v2933_v20, %v2953_v10  ;;  %v7333_v45 = vpack.c.bf16 %v2953_v10, %v2949_v4  ;;  %v3052_v10 = vsub.f32 %v7292_v6, %v7959_v62  ;;  %v7960_v8 = vand.u32 4294901760, %v7327_v0 }
 0x42b   :  { %v7336_v13 = vsub.f32 %v2936_v28, %v3498_v59  ;;  %v7340_v35 = vpack.c.bf16 %v3498_v59, %v3494_v18  ;;  %v3070_v63 = vsub.f32 %v7315_v34, %v7956_v58  ;;  %v7345_v33 = vsub.f32 %v2939_v9, %v3496_v15 }
 0x42c   :  { %5560 = vmatprep.subr.bf16.mxu0 %v7333_v45  ;;  %v7348_v20 = vpack.c.bf16 %v3496_v15, %v3492_v60  ;;  %v7958_v4 = vand.u32 4294901760, %v7331_v55  ;;  %v3578_v18 = vand.u32 4294901760, %v7284_v56  ;;  %v3058_v59 = vsub.f32 %v7287_v54, %v8000_v44 }
 0x42d   :  { %v7961_v37 = vand.u32 4294901760, %v7336_v13  ;;  %5562 = vmatpush1.bf16.msra.mxu0 %v7338_v38  ;;  %v5565_v15 = vpack.c.bf16 %v3047_v14, %v3035_v29  ;;  %v3595_v28 = vsub.f32 %v7310_v21, %v7957_v46  ;;  %v3606_v56 = vand.u32 4294901760, %v7345_v33 }
 0x42e   :  { %5608 = vmatprep.subr.bf16.mxu1 %v7348_v20  ;;  %5564 = vmatprep.subr.bf16.mxu0 %v5563_v53  ;;  %v3064_v60 = vsub.f32 %v7331_v55, %v7958_v4  ;;  %v3590_v9 = vand.u32 4294901760, %v3589_v25  ;;  %v3071_v44 = vand.u32 4294901760, %v3070_v63  ;;  %v3601_v58 = vsub.f32 %v7327_v0, %v7960_v8 }
 0x42f   :  { %5610 = vmatpush1.bf16.msra.mxu1 %v7340_v35  ;;  %v3613_v53 = vsub.f32 %v7336_v13, %v7961_v37  ;;  %v3053_v29 = vand.u32 4294901760, %v3052_v10  ;;  %v3607_v46 = vsub.f32 %v7345_v33, %v3606_v56  ;;  %v3059_v63 = vand.u32 4294901760, %v3058_v59 }
 0x430   :  { %5612 = vmatprep.subr.bf16.mxu1 %v5611_v2  ;;  %3019 = vmatmul.mubr.f32.vlgmr.msra.gmra.mrb[4].mxu0 %v6205_v50  ;;  %v3065_v14 = vand.u32 4294901760, %v3064_v60  ;;  %v5613_v25 = vpack.c.bf16 %v3590_v9, %v3578_v18  ;;  %v3602_v4 = vand.u32 4294901760, %v3601_v58  ;;  %v3596_v37 = vand.u32 4294901760, %v3595_v28 }
 0x431   :  { %5566 = vmatpush1.bf16.msra.mxu0 %v5565_v15  ;;  %v3614_v62 = vand.u32 4294901760, %v3613_v53  ;;  %3129 = vmatprep.mubr.f32.mxu0 %v7974_v27  ;;  %v3608_v2 = vand.u32 4294901760, %v3607_v46  ;;  %v5569_v32 = vpack.c.bf16 %v3071_v44, %v3059_v63  ;;  %v5571_v18 = vpack.c.bf16 %v7124_v41, %v7157_v52 }
 0x432   :  { %3562 = vmatmul.mubr.f32.vlgmr.msra.gmra.mrb[4].mxu1 %v6205_v50  ;;  %v5567_v8 = vpack.c.bf16 %v3065_v14, %v3053_v29  ;;  %v5619_v58 = vpack.c.bf16 %v7141_v42, %v7186_v39  ;;  %v5573_v46 = vpack.c.bf16 %v7169_v12, %v7175_v51  ;;  %v5625_v59 = vpack.c.bf16 %v7336_v13, %v7327_v0 }
 0x433   :  { %5614 = vmatpush1.bf16.msra.mxu1 %v5613_v25  ;;  %v5617_v10 = vpack.c.bf16 %v3614_v62, %v3602_v4  ;;  %3672 = vmatprep.mubr.f32.mxu1 %v7974_v27  ;;  %v5615_v60 = vpack.c.bf16 %v3608_v2, %v3596_v37  ;;  %v5575_v62 = vpack.c.bf16 %v7331_v55, %v7292_v6  ;;  %v8002_v15 = vand.u32 4294901760, %v7124_v41 }
 0x434   :  { %5568 = vmatprep.subr.bf16.mxu0 %v5567_v8  ;;  %v5621_v4 = vpack.c.bf16 %v7197_v36, %v7199_v40  ;;  %v5577_v37 = vpack.c.bf16 %v7315_v34, %v7287_v54  ;;  %v8001_v8 = vand.u32 4294901760, %v7157_v52  ;;  %v8003_v9 = vand.u32 4294901760, %v7186_v39 }
 0x435   :  { %5570 = vmatpush1.bf16.msra.mxu0 %v5569_v32  ;;  %5616 = vmatprep.subr.bf16.mxu1 %v5615_v60  ;;  %v5623_v32 = vpack.c.bf16 %v7345_v33, %v7310_v21  ;;  %v8004_v44 = vand.u32 4294901760, %v7141_v42  ;;  %v8005_v29 = vand.u32 4294901760, %v7175_v51  ;;  %v8006_v14 = vand.u32 4294901760, %v7169_v12 }
 0x436   :  { %5572 = vmatprep.subr.bf16.mxu0 %v5571_v18  ;;  %v5587_v28 = vpack.c.bf16 %v8002_v15, %v8001_v8  ;;  %v8007_v41 = vand.u32 4294901760, %v7292_v6  ;;  %v8008_v52 = vand.u32 4294901760, %v7331_v55  ;;  %v8009_v39 = vand.u32 4294901760, %v7199_v40 }
 0x437   :  { %5618 = vmatpush1.bf16.msra.mxu1 %v5617_v10  ;;  %v5635_v53 = vpack.c.bf16 %v8004_v44, %v8003_v9  ;;  %v5589_v25 = vpack.c.bf16 %v8006_v14, %v8005_v29  ;;  %v8010_v42 = vand.u32 4294901760, %v7197_v36  ;;  %v8011_v12 = vand.u32 4294901760, %v7310_v21 }
 0x438   :  { %5620 = vmatprep.subr.bf16.mxu1 %v5619_v58  ;;  %3131 = vmatmul.mubr.f32.vlgmr.msra.gmra.mrb[4].mxu0 %v6032_v48  ;;  %v5591_v63 = vpack.c.bf16 %v8008_v52, %v8007_v41  ;;  %v8012_v6 = vand.u32 4294901760, %v7287_v54  ;;  %v8013_v55 = vand.u32 4294901760, %v7315_v34  ;;  %v8014_v36 = vand.u32 4294901760, %v7327_v0 }
 0x439   :  { %5574 = vmatpush1.bf16.msra.mxu0 %v5573_v46  ;;  %3217 = vmatprep.mubr.f32.mxu0 %v7974_v27  ;;  %v5637_v2 = vpack.c.bf16 %v8010_v42, %v8009_v39  ;;  %v5639_v51 = vpack.c.bf16 %v3606_v56, %v8011_v12  ;;  %v8015_v40 = vand.u32 4294901760, %v7336_v13 }
 0x43a   :  { %3674 = vmatmul.mubr.f32.vlgmr.msra.gmra.mrb[4].mxu1 %v6032_v48  ;;  %5576 = vmatprep.subr.bf16.mxu0 %v5575_v62  ;;  %v5593_v10 = vpack.c.bf16 %v8013_v55, %v8012_v6 }
 0x43b   :  { %5622 = vmatpush1.bf16.msra.mxu1 %v5621_v4  ;;  %3760 = vmatprep.mubr.f32.mxu1 %v7974_v27  ;;  %v5641_v60 = vpack.c.bf16 %v8015_v40, %v8014_v36 }
 0x43c   :  { %5624 = vmatprep.subr.bf16.mxu1 %v5623_v32 }
 0x43d   :  { %5578 = vmatpush1.bf16.msra.mxu0 %v5577_v37 }
 0x43e   :  { %5580 = vmatprep.subr.bf16.mxu0 %v7155_v7 }
 0x43f   :  { %5626 = vmatpush1.bf16.msra.mxu1 %v5625_v59 }
 0x440   :  { %5628 = vmatprep.subr.bf16.mxu1 %v7173_v49  ;;  %3220 = vmatmul.mubr.f32.vlgmr.msra.gmra.mrb[4].mxu0 %v6113_v22 }
 0x441   :  { %5582 = vmatpush1.bf16.msra.mxu0 %v7166_v24  ;;  %3298 = vmatprep.mubr.f32.mxu0 %v7974_v27 }
 0x442   :  { %3763 = vmatmul.mubr.f32.vlgmr.msra.gmra.mrb[4].mxu1 %v6113_v22  ;;  %5584 = vmatprep.subr.bf16.mxu0 %v7333_v45 }
 0x443   :  { %5630 = vmatpush1.bf16.msra.mxu1 %v7178_v1  ;;  %3841 = vmatprep.mubr.f32.mxu1 %v7974_v27 }
 0x444   :  { %5632 = vmatprep.subr.bf16.mxu1 %v7348_v20 }
 0x445   :  { %5586 = vmatpush1.bf16.msra.mxu0 %v7338_v38 }
 0x446   :  { %5588 = vmatprep.subr.bf16.mxu0 %v5587_v28 }
 0x447   :  { %5634 = vmatpush1.bf16.msra.mxu1 %v7340_v35 }
 0x448   :  { %5636 = vmatprep.subr.bf16.mxu1 %v5635_v53  ;;  %3302 = vmatmul.mubr.f32.vlgmr.msra.gmra.mrb[4].mxu0 %v6163_v30 }
 0x449   :  { %5590 = vmatpush1.bf16.msra.mxu0 %v5589_v25  ;;  %3396 = vmatprep.mubr.f32.mxu0 %v7974_v27 }
 0x44a   :  { %3845 = vmatmul.mubr.f32.vlgmr.msra.gmra.mrb[4].mxu1 %v6163_v30  ;;  %5592 = vmatprep.subr.bf16.mxu0 %v5591_v63 }
 0x44b   :  { %5638 = vmatpush1.bf16.msra.mxu1 %v5637_v2  ;;  %3939 = vmatprep.mubr.f32.mxu1 %v7974_v27 }
 0x44c   :  { %5640 = vmatprep.subr.bf16.mxu1 %v5639_v51 }
 0x44d   :  { %5594 = vmatpush1.bf16.msra.mxu0 %v5593_v10 }
 0x44e   :  { %5596 = vmatprep.subr.bf16.mxu0 %v7155_v7 }
 0x44f   :  { %5642 = vmatpush1.bf16.msra.mxu1 %v5641_v60 }
 0x450   :  { %5644 = vmatprep.subr.bf16.mxu1 %v7173_v49  ;;  %3398 = vmatmul.mubr.f32.vlgmr.msra.gmra.mrb[4].mxu0 %v6032_v48 }
 0x451   :  { %5598 = vmatpush1.bf16.msra.mxu0 %v7166_v24  ;;  %3476 = vmatprep.mubr.f32.mxu0 %v7974_v27 }
 0x452   :  { %3941 = vmatmul.mubr.f32.vlgmr.msra.gmra.mrb[4].mxu1 %v6032_v48  ;;  %5600 = vmatprep.subr.bf16.mxu0 %v7333_v45 }
 0x453   :  { %5646 = vmatpush1.bf16.msra.mxu1 %v7178_v1  ;;  %4019 = vmatprep.mubr.f32.mxu1 %v7974_v27 }
 0x454   :  { %5648 = vmatprep.subr.bf16.mxu1 %v7348_v20 }
 0x455   :  { %5602 = vmatpush1.bf16.msra.mxu0 %v7338_v38 }
 0x457   :  { %5650 = vmatpush1.bf16.msra.mxu1 %v7340_v35 }
 0x458   :  { %3478 = vmatmul.mubr.f32.vlgmr.msra.gmra.mrb[4].mxu0 %v6032_v48 }
 0x459   :  { %4335 = vmatprep.mubr.f32.mxu0 %v7974_v27 }
 0x45a   :  { %4021 = vmatmul.mubr.f32.vlgmr.msra.gmra.mrb[4].mxu1 %v6032_v48 }
 0x45b   :  { %4878 = vmatprep.mubr.f32.mxu1 %v7974_v27 }
 0x52b   :  { %v3479_v7 = vpop.f32.mrb[4].mxu0 }
 0x52c   :  { %v7468_v24 = vadd.f32 %v3479_v7, %v6470_v5  ;;  %v3481_v33 = vpop.f32.mrb[5].mxu0 }
 0x52d   :  { %v7471_v49 = vadd.f32 %v3481_v33, %v6470_v5  ;;  %v4022_v1 = vpop.f32.mrb[4].mxu1 }
 0x52e   :  { %v4024_v21 = vpop.f32.mrb[5].mxu1  ;;  %4051 = vrot.lane.b32.xlu0 %v7468_v24, %s5874_s19  ;;  %v7478_v45 = vadd.f32 %v4022_v1, %v6470_v5  ;;  %v4163_v6 = vrot.slane %v7468_v24, 4 }
 0x52f   :  { %4053 = vrot.lane.b32.xlu1 %v7471_v49, %s5874_s19  ;;  %v7481_v0 = vadd.f32 %v4024_v21, %v6470_v5  ;;  %v4164_v55 = vrot.slane %v7471_v49, 4 }
 0x530   :  { %v4165_v60 = vrot.slane %v7478_v45, 4 }
 0x531   :  { %v4166_v7 = vrot.slane %v7481_v0, 4 }
 0x532   :  { %4055 = vrot.lane.b32.xlu0 %v7478_v45, %s5874_s19 }
 0x533   :  { %4057 = vrot.lane.b32.xlu1 %v7481_v0, %s5874_s19 }
 0x536   :  { %4063 = vrot.lane.b32.xlu0 %v7468_v24, %s5875_s20 }
 0x537   :  { %4065 = vrot.lane.b32.xlu1 %v7471_v49, %s5875_s20 }
 0x53a   :  { %4067 = vrot.lane.b32.xlu0 %v7478_v45, %s5875_s20 }
 0x53b   :  { %4069 = vrot.lane.b32.xlu1 %v7481_v0, %s5875_s20 }
 0x53e   :  { %4039 = vrot.lane.b32.xlu0 %v7468_v24, %s5876_s3 }
 0x53f   :  { %4041 = vrot.lane.b32.xlu1 %v7471_v49, %s5876_s3 }
 0x542   :  { %4043 = vrot.lane.b32.xlu0 %v7478_v45, %s5876_s3 }
 0x543   :  { %4045 = vrot.lane.b32.xlu1 %v7481_v0, %s5876_s3 }
 0x546   :  { %4075 = vrot.lane.b32.xlu0 %v7468_v24, %s5877_s21 }
 0x547   :  { %4077 = vrot.lane.b32.xlu1 %v7471_v49, %s5877_s21 }
 0x54a   :  { %4079 = vrot.lane.b32.xlu0 %v7478_v45, %s5877_s21 }
 0x54b   :  { %4081 = vrot.lane.b32.xlu1 %v7481_v0, %s5877_s21 }
 0x54e   :  { %4027 = vrot.lane.b32.xlu0 %v7468_v24, %s5878_s22 }
 0x54f   :  { %4029 = vrot.lane.b32.xlu1 %v7471_v49, %s5878_s22 }
 0x552   :  { %4031 = vrot.lane.b32.xlu0 %v7478_v45, %s5878_s22 }
 0x553   :  { %4033 = vrot.lane.b32.xlu1 %v7481_v0, %s5878_s22 }
 0x556   :  { %4087 = vrot.lane.b32.xlu0 %v7468_v24, %s5879_s23 }
 0x557   :  { %4089 = vrot.lane.b32.xlu1 %v7471_v49, %s5879_s23 }
 0x55a   :  { %4091 = vrot.lane.b32.xlu0 %v7478_v45, %s5879_s23 }
 0x55b   :  { %4093 = vrot.lane.b32.xlu1 %v7481_v0, %s5879_s23 }
 0x55e   :  { %4099 = vrot.lane.b32.xlu0 %v7468_v24, %s5880_s24 }
 0x55f   :  { %4101 = vrot.lane.b32.xlu1 %v7471_v49, %s5880_s24 }
 0x562   :  { %4103 = vrot.lane.b32.xlu0 %v7478_v45, %s5880_s24 }
 0x563   :  { %4105 = vrot.lane.b32.xlu1 %v7481_v0, %s5880_s24 }
 0x566   :  { %4111 = vrot.lane.b32.xlu0 %v7468_v24, %s5881_s25 }
 0x567   :  { %4113 = vrot.lane.b32.xlu1 %v7471_v49, %s5881_s25 }
 0x56a   :  { %4115 = vrot.lane.b32.xlu0 %v7478_v45, %s5881_s25 }
 0x56b   :  { %4117 = vrot.lane.b32.xlu1 %v7481_v0, %s5881_s25 }
 0x5a0   :  { %v4052_v54 = vpop.permute.xlu0 %4051 }
 0x5a1   :  { %v4054_v34 = vpop.permute.xlu1 %4053 }
 0x5a2   :  { %v4061_v32 = vsel %vm84_vm1, %v4052_v54, %v4054_v34 }
 0x5a3   :  { %v4140_v53 = vrot.slane %v4061_v32, 2 }
 0x5a4   :  { %v4056_v13 = vpop.permute.xlu0 %4055 }
 0x5a5   :  { %v4058_v38 = vpop.permute.xlu1 %4057  ;;  %v7555_v9 = vsel %vm84_vm1, %v4054_v34, %v4056_v13 }
 0x5a6   :  { %v7559_v44 = vsel %vm84_vm1, %v4058_v38, %v4052_v54  ;;  %v7563_v29 = vsel %vm84_vm1, %v4056_v13, %v4058_v38  ;;  %v4141_v39 = vrot.slane %v7555_v9, 2 }
 0x5a7   :  { %v4139_v42 = vrot.slane %v7559_v44, 2  ;;  %v4142_v12 = vrot.slane %v7563_v29, 2 }
 0x5a8   :  { %v4064_v35 = vpop.permute.xlu0 %4063 }
 0x5a9   :  { %v4066_v20 = vpop.permute.xlu1 %4065 }
 0x5aa   :  { %v4073_v62 = vsel %vm97_vm0, %v4064_v35, %v4066_v20 }
 0x5ab   :  { %v4152_v15 = vrot.slane %v4073_v62, 7 }
 0x5ac   :  { %v4068_v56 = vpop.permute.xlu0 %4067 }
 0x5ad   :  { %v4070_v18 = vpop.permute.xlu1 %4069  ;;  %v4072_v37 = vsel %vm97_vm0, %v4066_v20, %v4068_v56  ;;  %v4216_v2 = vsel %vm240_vm2, %v4140_v53, %v4152_v15 }
 0x5ae   :  { %v4074_v59 = vsel %vm97_vm0, %v4070_v18, %v4064_v35  ;;  %v4071_v28 = vsel %vm97_vm0, %v4068_v56, %v4070_v18  ;;  %v4153_v14 = vrot.slane %v4072_v37, 7  ;;  %v4220_v21 = vsel %vm245_vm5, %v4216_v2, %v4164_v55 }
 0x5af   :  { %v4151_v25 = vrot.slane %v4074_v59, 7  ;;  %v4154_v52 = vrot.slane %v4071_v28, 7 }
 0x5b0   :  { %v4040_v58 = vpop.permute.xlu0 %4039  ;;  %v4217_v10 = vsel %vm240_vm2, %v4141_v39, %v4153_v14 }
 0x5b1   :  { %v4042_v46 = vpop.permute.xlu1 %4041  ;;  %v4215_v36 = vsel %vm240_vm2, %v4139_v42, %v4151_v25  ;;  %v4218_v33 = vsel %vm240_vm2, %v4142_v12, %v4154_v52  ;;  %v4221_v20 = vsel %vm245_vm5, %v4217_v10, %v4165_v60 }
 0x5b2   :  { %v4049_v1 = vsel %vm71_vm6, %v4040_v58, %v4042_v46  ;;  %v4219_v13 = vsel %vm245_vm5, %v4215_v36, %v4163_v6  ;;  %v4222_v32 = vsel %vm245_vm5, %v4218_v33, %v4166_v7 }
 0x5b3   :  { %v4128_v56 = vrot.slane %v4049_v1, 5 }
 0x5b4   :  { %v4044_v4 = vpop.permute.xlu0 %4043 }
 0x5b5   :  { %v4046_v8 = vpop.permute.xlu1 %4045  ;;  %v4048_v18 = vsel %vm71_vm6, %v4042_v46, %v4044_v4 }
 0x5b6   :  { %v4047_v59 = vsel %vm71_vm6, %v4044_v4, %v4046_v8  ;;  %v4050_v15 = vsel %vm71_vm6, %v4046_v8, %v4040_v58  ;;  %v4129_v8 = vrot.slane %v4048_v18, 5 }
 0x5b7   :  { %v4127_v25 = vrot.slane %v4050_v15, 5 }
 0x5b8   :  { %v4076_v41 = vpop.permute.xlu0 %4075 }
 0x5b9   :  { %v4078_v63 = vpop.permute.xlu1 %4077 }
 0x5ba   :  { %v7571_v51 = vsel %vm110_vm4, %v4076_v41, %v4078_v63 }
 0x5bb   :  { %v4175_v54 = vrot.slane %v7571_v51, 1 }
 0x5bc   :  { %v4080_v40 = vpop.permute.xlu0 %4079 }
 0x5bd   :  { %v7585_v24 = vsel %vm110_vm4, %v4078_v63, %v4080_v40  ;;  %v4082_v49 = vpop.permute.xlu1 %4081  ;;  %v4223_v44 = vsel %vm250_vm7, %v4219_v13, %v4175_v54 }
 0x5be   :  { %v4176_v34 = vrot.slane %v7585_v24, 1  ;;  %v7591_v45 = vsel %vm110_vm4, %v4080_v40, %v4082_v49  ;;  %v7595_v0 = vsel %vm110_vm4, %v4082_v49, %v4076_v41  ;;  %v4130_v41 = vrot.slane %v4047_v59, 5 }
 0x5bf   :  { %v4177_v38 = vrot.slane %v7591_v45, 1  ;;  %v4178_v35 = vrot.slane %v7595_v0, 1  ;;  %v4239_v6 = vmul.f32 %v7102_v61, %v4223_v44 }
 0x5c0   :  { %v4224_v62 = vsel %vm250_vm7, %v4220_v21, %v4176_v34  ;;  %v4028_v37 = vpop.permute.xlu0 %4027 }
 0x5c1   :  { %v4240_v28 = vmul.f32 %v7077_v23, %v4224_v62  ;;  %v4226_v9 = vsel %vm250_vm7, %v4222_v32, %v4178_v35  ;;  %v4030_v46 = vpop.permute.xlu1 %4029  ;;  %v4225_v29 = vsel %vm250_vm7, %v4221_v20, %v4177_v38 }
 0x5c2   :  { %v4242_v4 = vmul.f32 %v7092_v57, %v4226_v9  ;;  %v4037_v58 = vsel %vm58_vm8, %v4028_v37, %v4030_v46  ;;  %v4241_v55 = vmul.f32 %v7108_v11, %v4225_v29 }
 0x5c3   :  { %v4208_v23 = vsel %vm230_vm9, %v4037_v58, %v4128_v56  ;;  %v4267_v14 = vand.u32 4294901760, %v4240_v28 }
 0x5c4   :  { %v4212_v52 = vsel %vm235_vm10, %v4208_v23, %v4140_v53  ;;  %v4032_v63 = vpop.permute.xlu0 %4031  ;;  %v4810_v2 = vand.u32 4294901760, %v4242_v4 }
 0x5c5   :  { %v4236_v10 = vmul.f32 %v7114_v31, %v4212_v52  ;;  %v4036_v57 = vsel %vm58_vm8, %v4030_v46, %v4032_v63  ;;  %v4034_v36 = vpop.permute.xlu1 %4033  ;;  %v7636_v7 = vsub.f32 %v4240_v28, %v4267_v14 }
 0x5c6   :  { %v4209_v40 = vsel %vm230_vm9, %v4036_v57, %v4129_v8  ;;  %v4035_v60 = vsel %vm58_vm8, %v4032_v63, %v4034_v36  ;;  %v4038_v53 = vsel %vm58_vm8, %v4034_v36, %v4028_v37  ;;  %v7644_v20 = vsub.f32 %v4242_v4, %v4810_v2 }
 0x5c7   :  { %v4213_v61 = vsel %vm235_vm10, %v4209_v40, %v4141_v39  ;;  %v4207_v11 = vsel %vm230_vm9, %v4038_v53, %v4127_v25  ;;  %v4210_v31 = vsel %vm230_vm9, %v4035_v60, %v4130_v41  ;;  %v4263_v33 = vand.u32 4294901760, %v4236_v10 }
 0x5c8   :  { %v4237_v1 = vmul.f32 %v7132_v19, %v4213_v61  ;;  %v4211_v21 = vsel %vm235_vm10, %v4207_v11, %v4139_v42  ;;  %v4214_v49 = vsel %vm235_vm10, %v4210_v31, %v4142_v12  ;;  %v4088_v13 = vpop.permute.xlu0 %4087  ;;  %v4269_v37 = vand.u32 4294901760, %v4239_v6 }
 0x5c9   :  { %v4235_v56 = vmul.f32 %v7146_v43, %v4211_v21  ;;  %v4238_v18 = vmul.f32 %v7152_v3, %v4214_v49  ;;  %v4090_v62 = vpop.permute.xlu1 %4089  ;;  %v7648_v39 = vpack.c.bf16 %v4267_v14, %v4263_v33  ;;  %v7650_v32 = vsub.f32 %v4236_v10, %v4263_v33 }
 0x5ca   :  { %v4808_v59 = vand.u32 4294901760, %v4237_v1  ;;  %v4361_v42 = vand.u32 4294901760, %v7636_v7  ;;  %v4097_v12 = vsel %vm123_vm11, %v4088_v13, %v4090_v62  ;;  %v4904_v43 = vand.u32 4294901760, %v7644_v20 }
 0x5cb   :  { %v4265_v15 = vand.u32 4294901760, %v4235_v56  ;;  %5652 = vmatprep.subr.bf16.mxu0 %v7648_v39  ;;  %v4806_v19 = vand.u32 4294901760, %v4238_v18  ;;  %v4812_v3 = vand.u32 4294901760, %v4241_v55  ;;  %v4349_v29 = vand.u32 4294901760, %v7650_v32 }
 0x5cc   :  { %v4092_v28 = vpop.permute.xlu0 %4091  ;;  %v7662_v4 = vsub.f32 %v4239_v6, %v4269_v37  ;;  %v4187_v14 = vrot.slane %v4097_v12, 6  ;;  %v4362_v41 = vsub.f32 %v7636_v7, %v4361_v42  ;;  %v7684_v10 = vsub.f32 %v7644_v20, %v4904_v43 }
 0x5cd   :  { %v4096_v9 = vsel %vm123_vm11, %v4090_v62, %v4092_v28  ;;  %v4094_v46 = vpop.permute.xlu1 %4093  ;;  %v7659_v44 = vpack.c.bf16 %v4269_v37, %v4265_v15  ;;  %v7666_v8 = vpack.c.bf16 %v4810_v2, %v4806_v19  ;;  %v7668_v23 = vsub.f32 %v4235_v56, %v4265_v15 }
 0x5ce   :  { %v4095_v58 = vsel %vm123_vm11, %v4092_v28, %v4094_v46  ;;  %v7671_v25 = vpack.c.bf16 %v4812_v3, %v4808_v59  ;;  %v4188_v52 = vrot.slane %v4096_v9, 6  ;;  %v4098_v63 = vsel %vm123_vm11, %v4094_v46, %v4088_v13 }
 0x5cf   :  { %5654 = vmatpush1.bf16.msra.mxu0 %v7659_v44  ;;  %5700 = vmatprep.subr.bf16.mxu1 %v7666_v8  ;;  %v7679_v6 = vsub.f32 %v4238_v18, %v4806_v19  ;;  %v4189_v57 = vrot.slane %v4095_v58, 6  ;;  %v4350_v40 = vsub.f32 %v7650_v32, %v4349_v29  ;;  %v7690_v60 = vsub.f32 %v4241_v55, %v4812_v3 }
 0x5d0   :  { %v4100_v2 = vpop.permute.xlu0 %4099  ;;  %5702 = vmatpush1.bf16.msra.mxu1 %v7671_v25  ;;  %v7692_v53 = vsub.f32 %v4237_v1, %v4808_v59  ;;  %v4367_v11 = vand.u32 4294901760, %v7662_v4  ;;  %v4227_v31 = vsel %vm255_vm12, %v4175_v54, %v4187_v14  ;;  %v4190_v33 = vrot.slane %v4098_v63, 6 }
 0x5d1   :  { %v4102_v36 = vpop.permute.xlu1 %4101  ;;  %v4355_v49 = vand.u32 4294901760, %v7668_v23  ;;  %v4228_v55 = vsel %vm255_vm12, %v4176_v34, %v4188_v52  ;;  %v4363_v1 = vand.u32 4294901760, %v4362_v41  ;;  %v4892_v56 = vand.u32 4294901760, %v7679_v6 }
 0x5d2   :  { %v4109_v61 = vsel %vm136_vm13, %v4100_v2, %v4102_v36  ;;  %v4906_v18 = vand.u32 4294901760, %v7684_v10  ;;  %v4229_v51 = vsel %vm255_vm12, %v4177_v38, %v4189_v57  ;;  %v4351_v59 = vand.u32 4294901760, %v4350_v40  ;;  %v8017_v40 = vld [vmem:[#allocation2_spill] sm:$0xff] }
 0x5d3   :  { %v4199_v21 = vrot.slane %v4109_v61, 3  ;;  %v4230_v45 = vsel %vm255_vm12, %v4178_v35, %v4190_v33  ;;  %v7723_v28 = vsub.f32 %v7668_v23, %v4355_v49  ;;  %v4893_v9 = vsub.f32 %v7679_v6, %v4892_v56 }
 0x5d4   :  { %v4104_v13 = vpop.permute.xlu0 %4103  ;;  %v7732_v0 = vsub.f32 %v7662_v4, %v4367_v11  ;;  %v4898_v35 = vand.u32 4294901760, %v7692_v53 }
 0x5d5   :  { %v4231_v54 = vsel %vm260_vm14, %v4227_v31, %v4199_v21  ;;  %v4108_v62 = vsel %vm136_vm13, %v4102_v36, %v4104_v13  ;;  %v4106_v37 = vpop.permute.xlu1 %4105  ;;  %v5659_v36 = vpack.c.bf16 %v4363_v1, %v4351_v59  ;;  %v4357_v33 = vand.u32 4294901760, %v7723_v28 }
 0x5d6   :  { %v4243_v24 = vmul.f32 %v7222_v47, %v4231_v54  ;;  %v4200_v34 = vrot.slane %v4108_v62, 3  ;;  %v4107_v15 = vsel %vm136_vm13, %v4104_v13, %v4106_v37  ;;  %v4110_v19 = vsel %vm136_vm13, %v4106_v37, %v4100_v2  ;;  %v8016_v2 = vld [vmem:[#allocation4_spill] sm:$0xff] }
 0x5d7   :  { %v4201_v38 = vrot.slane %v4107_v15, 3  ;;  %v4202_v12 = vrot.slane %v4110_v19, 3  ;;  %v4894_v13 = vand.u32 4294901760, %v4893_v9  ;;  %v8018_v19 = vld [vmem:[#allocation5_spill] sm:$0xff] }
 0x5d8   :  { %v4232_v47 = vsel %vm260_vm14, %v4228_v55, %v4200_v34  ;;  %v4112_v3 = vpop.permute.xlu0 %4111  ;;  %v4273_v46 = vand.u32 4294901760, %v4243_v24 }
 0x5d9   :  { %v4244_v58 = vmul.f32 %v7253_v17, %v4232_v47  ;;  %v4233_v14 = vsel %vm260_vm14, %v4229_v51, %v4201_v38  ;;  %v4234_v41 = vsel %vm260_vm14, %v4230_v45, %v4202_v12  ;;  %v4114_v52 = vpop.permute.xlu1 %4113  ;;  %v4910_v17 = vand.u32 4294901760, %v7690_v60 }
 0x5da   :  { %v4245_v63 = vmul.f32 %v7261_v26, %v4233_v14  ;;  %v4246_v10 = vmul.f32 %v8016_v2, %v4234_v41  ;;  %v4121_v57 = vsel %vm149_vm15, %v4112_v3, %v4114_v52  ;;  %v4369_v51 = vand.u32 4294901760, %v7732_v0  ;;  %v8020_v14 = vld [vmem:[#allocation6_spill] sm:$0xff] }
 0x5db   :  { %v4247_v61 = vmul.f32 %v8017_v40, %v4121_v57  ;;  %v4271_v31 = vand.u32 4294901760, %v4244_v58  ;;  %v4899_v26 = vsub.f32 %v7692_v53, %v4898_v35  ;;  %v7749_v54 = vsub.f32 %v4243_v24, %v4273_v46  ;;  %v8019_v24 = vld [vmem:[#allocation3_spill] sm:$0xff] }
 0x5dc   :  { %v4116_v21 = vpop.permute.xlu0 %4115  ;;  %v4814_v55 = vand.u32 4294901760, %v4246_v10  ;;  %v4816_v34 = vand.u32 4294901760, %v4245_v63  ;;  %v4911_v9 = vsub.f32 %v7690_v60, %v4910_v17 }
 0x5dd   :  { %v4252_v1 = vsel %vm230_vm9, %v4247_v61, 0  ;;  %v4120_v62 = vsel %vm149_vm15, %v4114_v52, %v4116_v21  ;;  %v4118_v37 = vpop.permute.xlu1 %4117  ;;  %v7754_v59 = vsub.f32 %v4244_v58, %v4271_v31  ;;  %v5707_v52 = vpack.c.bf16 %v4906_v18, %v4894_v13 }
 0x5de   :  { %v4277_v15 = vand.u32 4294901760, %v4252_v1  ;;  %v4248_v45 = vmul.f32 %v8018_v19, %v4120_v62  ;;  %v4119_v38 = vsel %vm149_vm15, %v4116_v21, %v4118_v37  ;;  %v4122_v12 = vsel %vm149_vm15, %v4118_v37, %v4112_v3 }
 0x5df   :  { %v4249_v28 = vmul.f32 %v8019_v24, %v4119_v38  ;;  %v7762_v47 = vsub.f32 %v4246_v10, %v4814_v55  ;;  %v4250_v41 = vmul.f32 %v8020_v14, %v4122_v12  ;;  %v4373_v16 = vand.u32 4294901760, %v7754_v59 }
 0x5e0   :  { %v7767_v0 = vsub.f32 %v4252_v1, %v4277_v15  ;;  %v4255_v58 = vsel %vm230_vm9, %v4248_v45, 0  ;;  %v4379_v3 = vand.u32 4294901760, %v7749_v54  ;;  %v7774_v10 = vsub.f32 %v4245_v63, %v4816_v34 }
 0x5e1   :  { %v4275_v2 = vand.u32 4294901760, %v4255_v58  ;;  %v4258_v57 = vsel %vm230_vm9, %v4249_v28, 0  ;;  %v4261_v61 = vsel %vm230_vm9, %v4250_v41, 0  ;;  %v4916_v18 = vand.u32 4294901760, %v7762_v47 }
 0x5e2   :  { %v7965_v40 = vand.u32 4294901760, %v7767_v0  ;;  %v4820_v21 = vand.u32 4294901760, %v4258_v57  ;;  %v4818_v62 = vand.u32 4294901760, %v4261_v61  ;;  %v7785_v19 = vpack.c.bf16 %v4277_v15, %v4273_v46 }
 0x5e3   :  { %v7778_v1 = vsub.f32 %v4255_v58, %v4275_v2  ;;  %v7780_v37 = vpack.c.bf16 %v4275_v2, %v4271_v31  ;;  %v4374_v31 = vsub.f32 %v7754_v59, %v4373_v16  ;;  %v4380_v15 = vsub.f32 %v7749_v54, %v4379_v3 }
 0x5e4   :  { %v7783_v13 = vsub.f32 %v4258_v57, %v4820_v21  ;;  %v7787_v45 = vpack.c.bf16 %v4820_v21, %v4816_v34  ;;  %v4392_v63 = vsub.f32 %v7767_v0, %v7965_v40  ;;  %v7792_v38 = vsub.f32 %v4261_v61, %v4818_v62 }
 0x5e5   :  { %5656 = vmatprep.subr.bf16.mxu0 %v7780_v37  ;;  %v7795_v12 = vpack.c.bf16 %v4818_v62, %v4814_v55  ;;  %v4385_v24 = vand.u32 4294901760, %v7778_v1  ;;  %v4900_v34 = vand.u32 4294901760, %v4899_v26  ;;  %v7963_v28 = vand.u32 4294901760, %v7774_v10 }
 0x5e6   :  { %v7964_v46 = vand.u32 4294901760, %v7783_v13  ;;  %5658 = vmatpush1.bf16.msra.mxu0 %v7785_v19  ;;  %v5661_v55 = vpack.c.bf16 %v4369_v51, %v4357_v33  ;;  %v4917_v14 = vsub.f32 %v7762_v47, %v4916_v18  ;;  %v4928_v26 = vand.u32 4294901760, %v7792_v38 }
 0x5e7   :  { %5704 = vmatprep.subr.bf16.mxu1 %v7795_v12  ;;  %5660 = vmatprep.subr.bf16.mxu0 %v5659_v36  ;;  %v4386_v58 = vsub.f32 %v7778_v1, %v4385_v24  ;;  %v4912_v41 = vand.u32 4294901760, %v4911_v9  ;;  %v4393_v2 = vand.u32 4294901760, %v4392_v63  ;;  %v4923_v57 = vsub.f32 %v7774_v10, %v7963_v28 }
 0x5e8   :  { %5706 = vmatpush1.bf16.msra.mxu1 %v7787_v45  ;;  %v4935_v36 = vsub.f32 %v7783_v13, %v7964_v46  ;;  %v4375_v33 = vand.u32 4294901760, %v4374_v31  ;;  %v4929_v61 = vsub.f32 %v7792_v38, %v4928_v26  ;;  %v4381_v21 = vand.u32 4294901760, %v4380_v15 }
 0x5e9   :  { %5708 = vmatprep.subr.bf16.mxu1 %v5707_v52  ;;  %4341 = vmatmul.mubr.f32.vlgmr.msra.gmra.mrb[6].mxu0 %v6205_v50  ;;  %v4387_v51 = vand.u32 4294901760, %v4386_v58  ;;  %v5709_v9 = vpack.c.bf16 %v4912_v41, %v4900_v34  ;;  %v4924_v62 = vand.u32 4294901760, %v4923_v57  ;;  %v4918_v46 = vand.u32 4294901760, %v4917_v14 }
 0x5ea   :  { %5662 = vmatpush1.bf16.msra.mxu0 %v5661_v55  ;;  %v4936_v63 = vand.u32 4294901760, %v4935_v36  ;;  %4451 = vmatprep.mubr.f32.mxu0 %v7974_v27  ;;  %v4930_v52 = vand.u32 4294901760, %v4929_v61  ;;  %v5665_v40 = vpack.c.bf16 %v4393_v2, %v4381_v21  ;;  %v5667_v34 = vpack.c.bf16 %v7636_v7, %v7650_v32 }
 0x5eb   :  { %4884 = vmatmul.mubr.f32.vlgmr.msra.gmra.mrb[6].mxu1 %v6205_v50  ;;  %v5663_v28 = vpack.c.bf16 %v4387_v51, %v4375_v33  ;;  %v5715_v15 = vpack.c.bf16 %v7644_v20, %v7679_v6  ;;  %v5669_v50 = vpack.c.bf16 %v7662_v4, %v7668_v23  ;;  %v5673_v55 = vpack.c.bf16 %v7767_v0, %v7749_v54 }
 0x5ec   :  { %5710 = vmatpush1.bf16.msra.mxu1 %v5709_v9  ;;  %v5713_v31 = vpack.c.bf16 %v4936_v63, %v4924_v62  ;;  %4994 = vmatprep.mubr.f32.mxu1 %v7974_v27  ;;  %v5711_v58 = vpack.c.bf16 %v4930_v52, %v4918_v46  ;;  %v5717_v46 = vpack.c.bf16 %v7690_v60, %v7692_v53 }
 0x5ed   :  { %5664 = vmatprep.subr.bf16.mxu0 %v5663_v28  ;;  %v5671_v28 = vpack.c.bf16 %v7778_v1, %v7754_v59  ;;  %v5721_v14 = vpack.c.bf16 %v7783_v13, %v7774_v10  ;;  %v5683_v41 = vpack.c.bf16 %v4361_v42, %v4349_v29  ;;  %v5685_v2 = vpack.c.bf16 %v4367_v11, %v4355_v49 }
 0x5ee   :  { %5666 = vmatpush1.bf16.msra.mxu0 %v5665_v40  ;;  %5712 = vmatprep.subr.bf16.mxu1 %v5711_v58  ;;  %v5719_v40 = vpack.c.bf16 %v7792_v38, %v7762_v47  ;;  %v5687_v7 = vpack.c.bf16 %v4385_v24, %v4373_v16  ;;  %v5733_v20 = vpack.c.bf16 %v4910_v17, %v4898_v35  ;;  %v8021_v42 = vand.u32 4294901760, %v7767_v0 }
 0x5ef   :  { %5668 = vmatprep.subr.bf16.mxu0 %v5667_v34  ;;  %v5735_v32 = vpack.c.bf16 %v4928_v26, %v4916_v18  ;;  %v8022_v29 = vand.u32 4294901760, %v7774_v10 }
 0x5f0   :  { %5714 = vmatpush1.bf16.msra.mxu1 %v5713_v31 }
 0x5f1   :  { %5716 = vmatprep.subr.bf16.mxu1 %v5715_v15  ;;  %4453 = vmatmul.mubr.f32.vlgmr.msra.gmra.mrb[6].mxu0 %v6032_v48 }
 0x5f2   :  { %5670 = vmatpush1.bf16.msra.mxu0 %v5669_v50  ;;  %4539 = vmatprep.mubr.f32.mxu0 %v7974_v27 }
 0x5f3   :  { %4996 = vmatmul.mubr.f32.vlgmr.msra.gmra.mrb[6].mxu1 %v6032_v48  ;;  %5672 = vmatprep.subr.bf16.mxu0 %v5671_v28 }
 0x5f4   :  { %5718 = vmatpush1.bf16.msra.mxu1 %v5717_v46  ;;  %5082 = vmatprep.mubr.f32.mxu1 %v7974_v27 }
 0x5f5   :  { %5720 = vmatprep.subr.bf16.mxu1 %v5719_v40 }
 0x5f6   :  { %5674 = vmatpush1.bf16.msra.mxu0 %v5673_v55 }
 0x5f7   :  { %5676 = vmatprep.subr.bf16.mxu0 %v7648_v39 }
 0x5f8   :  { %5722 = vmatpush1.bf16.msra.mxu1 %v5721_v14 }
 0x5f9   :  { %5724 = vmatprep.subr.bf16.mxu1 %v7666_v8  ;;  %4542 = vmatmul.mubr.f32.vlgmr.msra.gmra.mrb[6].mxu0 %v6113_v22 }
 0x5fa   :  { %5678 = vmatpush1.bf16.msra.mxu0 %v7659_v44  ;;  %4620 = vmatprep.mubr.f32.mxu0 %v7974_v27 }
 0x5fb   :  { %5085 = vmatmul.mubr.f32.vlgmr.msra.gmra.mrb[6].mxu1 %v6113_v22  ;;  %5680 = vmatprep.subr.bf16.mxu0 %v7780_v37  ;;  %v5731_v22 = vpack.c.bf16 %v4904_v43, %v4892_v56  ;;  %v5689_v43 = vpack.c.bf16 %v8021_v42, %v4379_v3 }
 0x5fc   :  { %5726 = vmatpush1.bf16.msra.mxu1 %v7671_v25  ;;  %5163 = vmatprep.mubr.f32.mxu1 %v7974_v27 }
 0x5fd   :  { %5728 = vmatprep.subr.bf16.mxu1 %v7795_v12 }
 0x5fe   :  { %5682 = vmatpush1.bf16.msra.mxu0 %v7785_v19 }
 0x5ff   :  { %5684 = vmatprep.subr.bf16.mxu0 %v5683_v41 }
 0x600   :  { %5730 = vmatpush1.bf16.msra.mxu1 %v7787_v45 }
 0x601   :  { %5732 = vmatprep.subr.bf16.mxu1 %v5731_v22  ;;  %4624 = vmatmul.mubr.f32.vlgmr.msra.gmra.mrb[6].mxu0 %v6163_v30 }
 0x602   :  { %5686 = vmatpush1.bf16.msra.mxu0 %v5685_v2  ;;  %4718 = vmatprep.mubr.f32.mxu0 %v7974_v27 }
 0x603   :  { %5167 = vmatmul.mubr.f32.vlgmr.msra.gmra.mrb[6].mxu1 %v6163_v30  ;;  %5688 = vmatprep.subr.bf16.mxu0 %v5687_v7  ;;  %v8023_v30 = vand.u32 4294901760, %v7783_v13 }
 0x604   :  { %5734 = vmatpush1.bf16.msra.mxu1 %v5733_v20  ;;  %5261 = vmatprep.mubr.f32.mxu1 %v7974_v27 }
 0x605   :  { %5736 = vmatprep.subr.bf16.mxu1 %v5735_v32  ;;  %v5737_v4 = vpack.c.bf16 %v8023_v30, %v8022_v29 }
 0x606   :  { %5690 = vmatpush1.bf16.msra.mxu0 %v5689_v43 }
 0x607   :  { %5692 = vmatprep.subr.bf16.mxu0 %v7648_v39 }
 0x608   :  { %5738 = vmatpush1.bf16.msra.mxu1 %v5737_v4 }
 0x609   :  { %5740 = vmatprep.subr.bf16.mxu1 %v7666_v8  ;;  %4720 = vmatmul.mubr.f32.vlgmr.msra.gmra.mrb[6].mxu0 %v6032_v48 }
 0x60a   :  { %5694 = vmatpush1.bf16.msra.mxu0 %v7659_v44  ;;  %4798 = vmatprep.mubr.f32.mxu0 %v7974_v27 }
 0x60b   :  { %5263 = vmatmul.mubr.f32.vlgmr.msra.gmra.mrb[6].mxu1 %v6032_v48  ;;  %5696 = vmatprep.subr.bf16.mxu0 %v7780_v37 }
 0x60c   :  { %5742 = vmatpush1.bf16.msra.mxu1 %v7671_v25  ;;  %5341 = vmatprep.mubr.f32.mxu1 %v7974_v27 }
 0x60d   :  { %5744 = vmatprep.subr.bf16.mxu1 %v7795_v12 }
 0x60e   :  { %5698 = vmatpush1.bf16.msra.mxu0 %v7785_v19 }
 0x610   :  { %5746 = vmatpush1.bf16.msra.mxu1 %v7787_v45 }
 0x611   :  { %4800 = vmatmul.mubr.f32.vlgmr.msra.gmra.mrb[6].mxu0 %v6032_v48 }
 0x613   :  { %5343 = vmatmul.mubr.f32.vlgmr.msra.gmra.mrb[6].mxu1 %v6032_v48 }
 0x6e4   :  { %v4801_v39 = vpop.f32.mrb[6].mxu0 }
 0x6e5   :  { %v5759_v44 = vadd.f32 %v4801_v39, %v6470_v5  ;;  %v4803_v8 = vpop.f32.mrb[7].mxu0 }
 0x6e6   :  { %v5760_v23 = vadd.f32 %v4803_v8, %v6470_v5  ;;  %v5344_v6 = vpop.f32.mrb[6].mxu1 }
 0x6e7   :  { %v5761_v25 = vadd.f32 %v5344_v6, %v6470_v5  ;;  %v5346_v27 = vpop.f32.mrb[7].mxu1 }
 0x6e8   :  { %v5353_v60 = vcombine.low %v5759_v44, %v5760_v23  ;;  %v5762_v53 = vadd.f32 %v5346_v27, %v6470_v5 }
 0x6ea   :  { %5357 = vst [vmem:[%s7925_s4] sm:$0x77] %v5353_v60  ;;  %v5354_v11 = vcombine.low %v5761_v25, %v5762_v53 }
 0x6ec   :  { %5358 = vst [vmem:[%s7925_s4 + $0x8] sm:$0x77] %v5354_v11 }

</bundles_post_ra>
